<compile_context>
chip_gen: v7x
topology: tpu7x:2x2x1
jax: 0.10.0
libtpu: 0.0.40
codegen_flags: <defaults>
</compile_context>

<pallas_src>
import functools

import numpy as np
import jax
import jax.numpy as jnp
from jax import lax
from jax.experimental import pallas as pl
from jax.experimental.pallas import tpu as pltpu


def _round_up(v, m):
    return ((v + m - 1) // m) * m


def _build_hw_masks(H, W, tile_d):
    """(9, tile_d*H*W) f32 {0,1}: validity of the (kh,kw) neighbour under zero
    padding.  Depth validity is handled by the zeroed d-halo slices, so the
    mask depends only on (h,w) and is tiled over the d-tile."""
    h = np.arange(H)[:, None]
    w = np.arange(W)[None, :]
    rows = []
    for kh in range(3):
        for kw in range(3):
            valid = ((h + kh - 1 >= 0) & (h + kh - 1 < H) &
                     (w + kw - 1 >= 0) & (w + kw - 1 < W))
            rows.append(np.tile(valid.reshape(-1), tile_d))
    return np.stack(rows).astype(np.float32)


def _vmem_limit_bytes(default=32 * 1024 * 1024):
    """Per-generation scoped-VMEM limit: ~3/4 of physical capacity."""
    try:
        cap = getattr(pltpu.get_tpu_info(), "vmem_capacity_bytes", None)
        if cap:
            return int(cap) * 3 // 4
    except Exception:
        pass
    return default


def _step_vmem_bytes(tile_d, HW, W, Cin_p, Cout_p):
    St = tile_d * HW
    padL = (-HW) % 128
    if padL < W + 1:
        padL += 128
    width = _round_up(padL + HW + St + HW + W + 1, 128)
    x_blk = 3 * 2 * Cin_p * St * 4      # cur/prev/next tiles, double-buffered
    o_blk = 2 * Cout_p * St * 4
    apad = Cin_p * width * 4
    return x_blk + o_blk + apad


def _pick_tile_d(D, HW, W, Cin_p, Cout_p, budget):
    cands = [td for td in range(D, 0, -1)
             if D % td == 0 and (td == D or (td * HW) % 128 == 0)]
    for td in cands:                     # largest lane-aligned d-tile first
        if _step_vmem_bytes(td, HW, W, Cin_p, Cout_p) <= budget:
            return td
    return cands[-1]


def _make_kernel(H, W, HW, St, Cin_p, Cout_p, padL, base, width, DT):
    def kernel(xc_ref, xp_ref, xn_ref, scale_ref, shift_ref, w_ref, bias_ref,
               mask_ref, o_ref, apad_ref):
        # xc/xp/xn : (1, Cin_p, St)   current / previous / next d-tile (raw x)
        # scale/shift: (Cin_p, 1)     folded train-mode BN
        # w_ref    : (27, Cout_p, Cin_p) per-tap weights, tap = kd*9+kh*3+kw
        # bias_ref : (Cout_p, 1)
        # mask_ref : (9, St)          (kh,kw) validity masks
        # o_ref    : (1, Cout_p, St)
        # apad_ref : (Cin_p, width)   [0s | prev slice | tile | next slice | 0s]
        t = pl.program_id(1)
        scale = scale_ref[...]
        shift = shift_ref[...]

        # Zero the lane pads each step (garbage-safe multiply-by-mask; no
        # persistent scratch state, so megacore "parallel" sharding is safe).
        apad_ref[:, :padL] = jnp.zeros((Cin_p, padL), jnp.float32)
        apad_ref[:, base + St + HW:] = jnp.zeros(
            (Cin_p, width - (base + St + HW)), jnp.float32)

        # BN (folded scale/shift) + ReLU for the current tile, lane-aligned store.
        a_cur = jnp.maximum(xc_ref[0] * scale + shift, 0.0)           # (Cin_p, St)
        apad_ref[:, base:base + St] = a_cur

        # 1-slice depth halos, zeroed at the global volume boundary.
        use_p = (t > 0).astype(jnp.float32)
        use_n = (t < DT - 1).astype(jnp.float32)
        a_prev = jnp.maximum(xp_ref[0, :, St - HW:] * scale + shift, 0.0) * use_p
        a_next = jnp.maximum(xn_ref[0, :, :HW] * scale + shift, 0.0) * use_n
        apad_ref[:, padL:base] = a_prev
        apad_ref[:, base + St:base + St + HW] = a_next

        # 27 accumulating MXU matmuls; accumulator stays in vregs at these tile
        # sizes (switch to a VMEM scratch if Cout_p*St outgrows the vreg file).
        acc = None
        for kh in range(3):
            for kw in range(3):
                m = None
                if not (kh == 1 and kw == 1):
                    r = kh * 3 + kw
                    m = mask_ref[r:r + 1, :]                          # (1, St)
                for kd in range(3):
                    if kd == 1 and kh == 1 and kw == 1:
                        slab = a_cur                                  # centre tap reuse
                    else:
                        d0 = base + (kd - 1) * HW + (kh - 1) * W + (kw - 1)
                        slab = apad_ref[:, d0:d0 + St]                # (Cin_p, St)
                    if m is not None:
                        slab = slab * m
                    contrib = jnp.dot(w_ref[kd * 9 + kh * 3 + kw], slab,
                                      preferred_element_type=jnp.float32)
                    acc = contrib if acc is None else acc + contrib

        # Conv bias as a broadcast VPU add; lane-dense output store.
        o_ref[0] = (acc + bias_ref[...]).astype(o_ref.dtype)

    return kernel


def conv3d_forward(x, gamma, beta, conv_w, conv_b, eps=1e-5, tile_d=None):
    """BnRelu3d -> Conv3d(k=3,s=1,p=1): (N,Cin,D,H,W) f32 -> (N,Cout,D,H,W) f32."""
    N, Cin, D, H, W = x.shape
    Cout = conv_w.shape[0]
    HW, S = H * W, D * H * W

    # Native NCDHW consumed directly: contiguous reshape only, no transpose.
    x = x.astype(jnp.float32).reshape(N, Cin, S)

    # Train-mode BatchNorm3d batch stats in ONE pass over x (E[x^2]-E[x]^2),
    # folded to per-channel scale/shift.
    s1 = jnp.mean(x, axis=(0, 2))
    s2 = jnp.mean(jnp.square(x), axis=(0, 2))
    var = jnp.maximum(s2 - jnp.square(s1), 0.0)
    scale = gamma.astype(jnp.float32) * lax.rsqrt(var + eps)
    shift = beta.astype(jnp.float32) - s1 * scale

    # Pad channel dims to multiples of 8 so slab stores / matmul operands are
    # sublane-aligned (padded channels have zero scale/shift/weights -> no-op).
    Cin_p, Cout_p = _round_up(Cin, 8), _round_up(Cout, 8)
    if Cin_p != Cin:
        x = jnp.pad(x, ((0, 0), (0, Cin_p - Cin), (0, 0)))
    scale = jnp.pad(scale, (0, Cin_p - Cin)).reshape(Cin_p, 1)
    shift = jnp.pad(shift, (0, Cin_p - Cin)).reshape(Cin_p, 1)

    # (Cout, Cin, 3,3,3) -> (27, Cout_p, Cin_p) per-tap weights; bias separate.
    w_taps = jnp.transpose(conv_w.astype(jnp.float32),
                           (2, 3, 4, 0, 1)).reshape(27, Cout, Cin)
    w_taps = jnp.pad(w_taps, ((0, 0), (0, Cout_p - Cout), (0, Cin_p - Cin)))
    bias = jnp.pad(conv_b.astype(jnp.float32), (0, Cout_p - Cout)).reshape(Cout_p, 1)

    vmem_limit = _vmem_limit_bytes()
    if tile_d is None:
        tile_d = _pick_tile_d(D, HW, W, Cin_p, Cout_p, vmem_limit // 2)
    assert D % tile_d == 0, "tile_d must divide D"  # TODO(synk): pad D otherwise
    St = tile_d * HW
    assert St % 128 == 0 or tile_d == D, "d-tile span must be lane aligned"
    DT = D // tile_d

    masks = jnp.asarray(_build_hw_masks(H, W, tile_d))                # (9, St)

    # Flat lane halo so every tap shift (|delta| <= HW+W+1) reads in-bounds;
    # padL chosen so the main activation store lands on a 128-lane boundary.
    padL = (-HW) % 128
    if padL < W + 1:
        padL += 128
    base = padL + HW
    width = _round_up(base + St + HW + W + 1, 128)

    kernel = _make_kernel(H, W, HW, St, Cin_p, Cout_p, padL, base, width, DT)

    out = pl.pallas_call(
        kernel,
        out_shape=jax.ShapeDtypeStruct((N, Cout_p, S), jnp.float32),
        grid_spec=pltpu.PrefetchScalarGridSpec(
            num_scalar_prefetch=0,
            grid=(N, DT),
            in_specs=[
                pl.BlockSpec((1, Cin_p, St), lambda n, t: (n, 0, t)),
                pl.BlockSpec((1, Cin_p, St),
                             lambda n, t: (n, 0, jnp.maximum(t - 1, 0))),
                pl.BlockSpec((1, Cin_p, St),
                             lambda n, t: (n, 0, jnp.minimum(t + 1, DT - 1))),
                pl.BlockSpec((Cin_p, 1), lambda n, t: (0, 0)),         # BN scale
                pl.BlockSpec((Cin_p, 1), lambda n, t: (0, 0)),         # BN shift
                pl.BlockSpec((27, Cout_p, Cin_p), lambda n, t: (0, 0, 0)),
                pl.BlockSpec((Cout_p, 1), lambda n, t: (0, 0)),        # conv bias
                pl.BlockSpec((9, St), lambda n, t: (0, 0)),            # hw masks
            ],
            out_specs=pl.BlockSpec((1, Cout_p, St), lambda n, t: (n, 0, t)),
            scratch_shapes=[pltpu.VMEM((Cin_p, width), jnp.float32)],
        ),
        compiler_params=pltpu.CompilerParams(
            dimension_semantics=("parallel", "parallel"),
            vmem_limit_bytes=vmem_limit,
        ),
    )(x, x, x, scale, shift, w_taps, bias, masks)

    if Cout_p != Cout:
        out = out[:, :Cout, :]
    return out.reshape(N, Cout, D, H, W)


def _reference_forward(x, gamma, beta, conv_w, conv_b, eps=1e-5):
    """Pure-JAX reference (same math, f32) for the correctness check."""
    mean = jnp.mean(x, axis=(0, 2, 3, 4), keepdims=True)
    var = jnp.mean(jnp.square(x - mean), axis=(0, 2, 3, 4), keepdims=True)
    g = gamma[None, :, None, None, None]
    b = beta[None, :, None, None, None]
    a = jnp.maximum((x - mean) / jnp.sqrt(var + eps) * g + b, 0.0)
    y = lax.conv_general_dilated(
        a, conv_w, window_strides=(1, 1, 1),
        padding=((1, 1), (1, 1), (1, 1)),
        dimension_numbers=("NCDHW", "OIDHW", "NCDHW"),
        precision=lax.Precision.HIGHEST,
    )
    return y + conv_b[None, :, None, None, None]


if __name__ == "__main__":
    # small shapes consistent with the module: N=2, Cin=4, Cout=8, D=4, H=W=8
    N, Cin, Cout, D, H, W = 2, 4, 8, 4, 8, 8

    key = jax.random.PRNGKey(0)
    k1, k2, k3, k4, k5 = jax.random.split(key, 5)

    x = jax.random.normal(k1, (N, Cin, D, H, W), jnp.float32)
    gamma = 1.0 + 0.1 * jax.random.normal(k2, (Cin,), jnp.float32)
    beta = 0.1 * jax.random.normal(k3, (Cin,), jnp.float32)
    bound = 1.0 / np.sqrt(Cin * 27)
    conv_w = jax.random.uniform(k4, (Cout, Cin, 3, 3, 3), jnp.float32, -bound, bound)
    conv_b = jax.random.uniform(k5, (Cout,), jnp.float32, -bound, bound)

    y_ref = jax.block_until_ready(_reference_forward(x, gamma, beta, conv_w, conv_b))

    # tile_d=2 exercises the cross-tile d-halo path at the small test shape.
    fwd_tiled = jax.jit(functools.partial(conv3d_forward, tile_d=2))
    y_tiled = jax.block_until_ready(fwd_tiled(x, gamma, beta, conv_w, conv_b))
    np.testing.assert_allclose(np.asarray(y_tiled), np.asarray(y_ref),
                               rtol=1e-4, atol=1e-4)

    # auto tile_d (picks the full depth here) exercises the boundary-zeroed path.
    fwd_auto = jax.jit(conv3d_forward)
    y_auto = jax.block_until_ready(fwd_auto(x, gamma, beta, conv_w, conv_b))
    np.testing.assert_allclose(np.asarray(y_auto), np.asarray(y_ref),
                               rtol=1e-4, atol=1e-4)

    print("KERNEL_OK")
</pallas_src>

<mosaic_0001>
module attributes {stable_mosaic.version = 11 : i64} {
  func.func @kernel(%arg0: i32, %arg1: i32, %arg2: memref<1x8x128xf32, #tpu.memory_space<vmem>>, %arg3: memref<1x8x128xf32, #tpu.memory_space<vmem>>, %arg4: memref<1x8x128xf32, #tpu.memory_space<vmem>>, %arg5: memref<8x1xf32, #tpu.memory_space<vmem>>, %arg6: memref<8x1xf32, #tpu.memory_space<vmem>>, %arg7: memref<27x8x8xf32, #tpu.memory_space<vmem>>, %arg8: memref<8x1xf32, #tpu.memory_space<vmem>>, %arg9: memref<9x128xf32, #tpu.memory_space<vmem>>, %arg10: memref<1x8x128xf32, #tpu.memory_space<vmem>>, %arg11: memref<8x384xf32, #tpu.memory_space<vmem>>) attributes {dimension_semantics = [#tpu.dimension_semantics<parallel>, #tpu.dimension_semantics<parallel>], iteration_bounds = array<i64: 2, 2>, scalar_prefetch = 0 : i64, scratch_operands = 1 : i64, tpu.core_type = #tpu.core_type<tc>, window_params = [{transform_indices = @transform_0, window_bounds = array<i64: 1, 8, 128>}, {transform_indices = @transform_1, window_bounds = array<i64: 1, 8, 128>}, {transform_indices = @transform_2, window_bounds = array<i64: 1, 8, 128>}, {pipeline_mode = #tpu.pipeline_mode<synchronous>, transform_indices = @transform_3, window_bounds = array<i64: 8, 1>}, {pipeline_mode = #tpu.pipeline_mode<synchronous>, transform_indices = @transform_4, window_bounds = array<i64: 8, 1>}, {pipeline_mode = #tpu.pipeline_mode<synchronous>, transform_indices = @transform_5, window_bounds = array<i64: 27, 8, 8>}, {pipeline_mode = #tpu.pipeline_mode<synchronous>, transform_indices = @transform_6, window_bounds = array<i64: 8, 1>}, {pipeline_mode = #tpu.pipeline_mode<synchronous>, transform_indices = @transform_7, window_bounds = array<i64: 9, 128>}, {transform_indices = @transform_8, window_bounds = array<i64: 1, 8, 128>}]} {
    %c0 = arith.constant 0 : index
    %c0_0 = arith.constant 0 : index
    %0 = vector.load %arg5[%c0, %c0_0] : memref<8x1xf32, #tpu.memory_space<vmem>>, vector<8x1xf32>
    %c0_1 = arith.constant 0 : index
    %c0_2 = arith.constant 0 : index
    %1 = vector.load %arg6[%c0_1, %c0_2] : memref<8x1xf32, #tpu.memory_space<vmem>>, vector<8x1xf32>
    %cst = arith.constant 0.000000e+00 : f32
    %2 = vector.broadcast %cst : f32 to vector<8x64xf32>
    %c0_3 = arith.constant 0 : index
    %c0_4 = arith.constant 0 : index
    %3 = vector.load %arg11[%c0_3, %c0_4] : memref<8x384xf32, #tpu.memory_space<vmem>>, vector<8x64xf32>
    tpu.vector_store %arg11[%c0_3, %c0_4], %2 {strides = array<i32>} : memref<8x384xf32, #tpu.memory_space<vmem>>, vector<8x64xf32>,
    %cst_5 = arith.constant 0.000000e+00 : f32
    %4 = vector.broadcast %cst_5 : f32 to vector<8x64xf32>
    %c0_6 = arith.constant 0 : index
    %c320 = arith.constant 320 : index
    %5 = vector.load %arg11[%c0_6, %c320] : memref<8x384xf32, #tpu.memory_space<vmem>>, vector<8x64xf32>
    tpu.vector_store %arg11[%c0_6, %c320], %4 {strides = array<i32>} : memref<8x384xf32, #tpu.memory_space<vmem>>, vector<8x64xf32>,
    %c0_7 = arith.constant 0 : index
    %c0_8 = arith.constant 0 : index
    %c0_9 = arith.constant 0 : index
    %6 = vector.load %arg2[%c0_7, %c0_8, %c0_9] : memref<1x8x128xf32, #tpu.memory_space<vmem>>, vector<1x8x128xf32>
    %7 = vector.shape_cast %6 : vector<1x8x128xf32> to vector<8x128xf32>
    %8 = vector.broadcast %0 : vector<8x1xf32> to vector<8x128xf32>
    %9 = arith.mulf %7, %8 : vector<8x128xf32>
    %10 = vector.broadcast %1 : vector<8x1xf32> to vector<8x128xf32>
    %11 = arith.addf %9, %10 : vector<8x128xf32>
    %cst_10 = arith.constant 0.000000e+00 : f32
    %12 = vector.broadcast %cst_10 : f32 to vector<8x128xf32>
    %13 = arith.maximumf %11, %12 : vector<8x128xf32>
    %c0_11 = arith.constant 0 : index
    %c128 = arith.constant 128 : index
    %14 = vector.load %arg11[%c0_11, %c128] : memref<8x384xf32, #tpu.memory_space<vmem>>, vector<8x128xf32>
    tpu.vector_store %arg11[%c0_11, %c128], %13 {strides = array<i32>} : memref<8x384xf32, #tpu.memory_space<vmem>>, vector<8x128xf32>,
    %c0_i32 = arith.constant 0 : i32
    %15 = arith.cmpi sgt, %arg1, %c0_i32 : i32
    %16 = arith.extui %15 : i1 to i32
    %17 = arith.sitofp %16 : i32 to f32
    %c1_i32 = arith.constant 1 : i32
    %18 = arith.cmpi slt, %arg1, %c1_i32 : i32
    %19 = arith.extui %18 : i1 to i32
    %20 = arith.sitofp %19 : i32 to f32
    %c0_12 = arith.constant 0 : index
    %c0_13 = arith.constant 0 : index
    %c64 = arith.constant 64 : index
    %21 = vector.load %arg3[%c0_12, %c0_13, %c64] : memref<1x8x128xf32, #tpu.memory_space<vmem>>, vector<1x8x64xf32>
    %22 = vector.shape_cast %21 : vector<1x8x64xf32> to vector<8x64xf32>
    %23 = vector.broadcast %0 : vector<8x1xf32> to vector<8x64xf32>
    %24 = arith.mulf %22, %23 : vector<8x64xf32>
    %25 = vector.broadcast %1 : vector<8x1xf32> to vector<8x64xf32>
    %26 = arith.addf %24, %25 : vector<8x64xf32>
    %cst_14 = arith.constant 0.000000e+00 : f32
    %27 = vector.broadcast %cst_14 : f32 to vector<8x64xf32>
    %28 = arith.maximumf %26, %27 : vector<8x64xf32>
    %29 = vector.broadcast %17 : f32 to vector<8x64xf32>
    %30 = arith.mulf %28, %29 : vector<8x64xf32>
    %c0_15 = arith.constant 0 : index
    %c0_16 = arith.constant 0 : index
    %c0_17 = arith.constant 0 : index
    %31 = vector.load %arg4[%c0_15, %c0_16, %c0_17] : memref<1x8x128xf32, #tpu.memory_space<vmem>>, vector<1x8x64xf32>
    %32 = vector.shape_cast %31 : vector<1x8x64xf32> to vector<8x64xf32>
    %33 = vector.broadcast %0 : vector<8x1xf32> to vector<8x64xf32>
    %34 = arith.mulf %32, %33 : vector<8x64xf32>
    %35 = vector.broadcast %1 : vector<8x1xf32> to vector<8x64xf32>
    %36 = arith.addf %34, %35 : vector<8x64xf32>
    %cst_18 = arith.constant 0.000000e+00 : f32
    %37 = vector.broadcast %cst_18 : f32 to vector<8x64xf32>
    %38 = arith.maximumf %36, %37 : vector<8x64xf32>
    %39 = vector.broadcast %20 : f32 to vector<8x64xf32>
    %40 = arith.mulf %38, %39 : vector<8x64xf32>
    %c0_19 = arith.constant 0 : index
    %c64_20 = arith.constant 64 : index
    %41 = vector.load %arg11[%c0_19, %c64_20] : memref<8x384xf32, #tpu.memory_space<vmem>>, vector<8x64xf32>
    tpu.vector_store %arg11[%c0_19, %c64_20], %30 {strides = array<i32>} : memref<8x384xf32, #tpu.memory_space<vmem>>, vector<8x64xf32>,
    %c0_21 = arith.constant 0 : index
    %c256 = arith.constant 256 : index
    %42 = vector.load %arg11[%c0_21, %c256] : memref<8x384xf32, #tpu.memory_space<vmem>>, vector<8x64xf32>
    tpu.vector_store %arg11[%c0_21, %c256], %40 {strides = array<i32>} : memref<8x384xf32, #tpu.memory_space<vmem>>, vector<8x64xf32>,
    %c0_22 = arith.constant 0 : index
    %c0_23 = arith.constant 0 : index
    %43 = vector.load %arg9[%c0_22, %c0_23] : memref<9x128xf32, #tpu.memory_space<vmem>>, vector<1x128xf32>
    %c0_24 = arith.constant 0 : index
    %c55 = arith.constant 55 : index
    %44 = vector.load %arg11[%c0_24, %c55] : memref<8x384xf32, #tpu.memory_space<vmem>>, vector<8x128xf32>
    %45 = vector.broadcast %43 : vector<1x128xf32> to vector<8x128xf32>
    %46 = arith.mulf %44, %45 : vector<8x128xf32>
    %c0_25 = arith.constant 0 : index
    %c0_26 = arith.constant 0 : index
    %c0_27 = arith.constant 0 : index
    %47 = vector.load %arg7[%c0_25, %c0_26, %c0_27] : memref<27x8x8xf32, #tpu.memory_space<vmem>>, vector<1x8x8xf32>
    %48 = vector.shape_cast %47 : vector<1x8x8xf32> to vector<8x8xf32>
    %cst_28 = arith.constant dense<0.000000e+00> : vector<8x128xf32>
    %49 = tpu.matmul %48, %46, %cst_28 {dimension_numbers = #tpu.dot_dimension_numbers<[1], [0], [0], [1], [0, 0, 1, 1], [], []>} : vector<8x8xf32>, vector<8x128xf32>, vector<8x128xf32> -> vector<8x128xf32>
    %c0_29 = arith.constant 0 : index
    %c119 = arith.constant 119 : index
    %50 = vector.load %arg11[%c0_29, %c119] : memref<8x384xf32, #tpu.memory_space<vmem>>, vector<8x128xf32>
    %51 = vector.broadcast %43 : vector<1x128xf32> to vector<8x128xf32>
    %52 = arith.mulf %50, %51 : vector<8x128xf32>
    %c9 = arith.constant 9 : index
    %c0_30 = arith.constant 0 : index
    %c0_31 = arith.constant 0 : index
    %53 = vector.load %arg7[%c9, %c0_30, %c0_31] : memref<27x8x8xf32, #tpu.memory_space<vmem>>, vector<1x8x8xf32>
    %54 = vector.shape_cast %53 : vector<1x8x8xf32> to vector<8x8xf32>
    %cst_32 = arith.constant dense<0.000000e+00> : vector<8x128xf32>
    %55 = tpu.matmul %54, %52, %cst_32 {dimension_numbers = #tpu.dot_dimension_numbers<[1], [0], [0], [1], [0, 0, 1, 1], [], []>} : vector<8x8xf32>, vector<8x128xf32>, vector<8x128xf32> -> vector<8x128xf32>
    %56 = arith.addf %49, %55 : vector<8x128xf32>
    %c0_33 = arith.constant 0 : index
    %c183 = arith.constant 183 : index
    %57 = vector.load %arg11[%c0_33, %c183] : memref<8x384xf32, #tpu.memory_space<vmem>>, vector<8x128xf32>
    %58 = vector.broadcast %43 : vector<1x128xf32> to vector<8x128xf32>
    %59 = arith.mulf %57, %58 : vector<8x128xf32>
    %c18 = arith.constant 18 : index
    %c0_34 = arith.constant 0 : index
    %c0_35 = arith.constant 0 : index
    %60 = vector.load %arg7[%c18, %c0_34, %c0_35] : memref<27x8x8xf32, #tpu.memory_space<vmem>>, vector<1x8x8xf32>
    %61 = vector.shape_cast %60 : vector<1x8x8xf32> to vector<8x8xf32>
    %cst_36 = arith.constant dense<0.000000e+00> : vector<8x128xf32>
    %62 = tpu.matmul %61, %59, %cst_36 {dimension_numbers = #tpu.dot_dimension_numbers<[1], [0], [0], [1], [0, 0, 1, 1], [], []>} : vector<8x8xf32>, vector<8x128xf32>, vector<8x128xf32> -> vector<8x128xf32>
    %63 = arith.addf %56, %62 : vector<8x128xf32>
    %c1 = arith.constant 1 : index
    %c0_37 = arith.constant 0 : index
    %64 = vector.load %arg9[%c1, %c0_37] : memref<9x128xf32, #tpu.memory_space<vmem>>, vector<1x128xf32>
    %c0_38 = arith.constant 0 : index
    %c56 = arith.constant 56 : index
    %65 = vector.load %arg11[%c0_38, %c56] : memref<8x384xf32, #tpu.memory_space<vmem>>, vector<8x128xf32>
    %66 = vector.broadcast %64 : vector<1x128xf32> to vector<8x128xf32>
    %67 = arith.mulf %65, %66 : vector<8x128xf32>
    %c1_39 = arith.constant 1 : index
    %c0_40 = arith.constant 0 : index
    %c0_41 = arith.constant 0 : index
    %68 = vector.load %arg7[%c1_39, %c0_40, %c0_41] : memref<27x8x8xf32, #tpu.memory_space<vmem>>, vector<1x8x8xf32>
    %69 = vector.shape_cast %68 : vector<1x8x8xf32> to vector<8x8xf32>
    %cst_42 = arith.constant dense<0.000000e+00> : vector<8x128xf32>
    %70 = tpu.matmul %69, %67, %cst_42 {dimension_numbers = #tpu.dot_dimension_numbers<[1], [0], [0], [1], [0, 0, 1, 1], [], []>} : vector<8x8xf32>, vector<8x128xf32>, vector<8x128xf32> -> vector<8x128xf32>
    %71 = arith.addf %63, %70 : vector<8x128xf32>
    %c0_43 = arith.constant 0 : index
    %c120 = arith.constant 120 : index
    %72 = vector.load %arg11[%c0_43, %c120] : memref<8x384xf32, #tpu.memory_space<vmem>>, vector<8x128xf32>
    %73 = vector.broadcast %64 : vector<1x128xf32> to vector<8x128xf32>
    %74 = arith.mulf %72, %73 : vector<8x128xf32>
    %c10 = arith.constant 10 : index
    %c0_44 = arith.constant 0 : index
    %c0_45 = arith.constant 0 : index
    %75 = vector.load %arg7[%c10, %c0_44, %c0_45] : memref<27x8x8xf32, #tpu.memory_space<vmem>>, vector<1x8x8xf32>
    %76 = vector.shape_cast %75 : vector<1x8x8xf32> to vector<8x8xf32>
    %cst_46 = arith.constant dense<0.000000e+00> : vector<8x128xf32>
    %77 = tpu.matmul %76, %74, %cst_46 {dimension_numbers = #tpu.dot_dimension_numbers<[1], [0], [0], [1], [0, 0, 1, 1], [], []>} : vector<8x8xf32>, vector<8x128xf32>, vector<8x128xf32> -> vector<8x128xf32>
    %78 = arith.addf %71, %77 : vector<8x128xf32>
    %c0_47 = arith.constant 0 : index
    %c184 = arith.constant 184 : index
    %79 = vector.load %arg11[%c0_47, %c184] : memref<8x384xf32, #tpu.memory_space<vmem>>, vector<8x128xf32>
    %80 = vector.broadcast %64 : vector<1x128xf32> to vector<8x128xf32>
    %81 = arith.mulf %79, %80 : vector<8x128xf32>
    %c19 = arith.constant 19 : index
    %c0_48 = arith.constant 0 : index
    %c0_49 = arith.constant 0 : index
    %82 = vector.load %arg7[%c19, %c0_48, %c0_49] : memref<27x8x8xf32, #tpu.memory_space<vmem>>, vector<1x8x8xf32>
    %83 = vector.shape_cast %82 : vector<1x8x8xf32> to vector<8x8xf32>
    %cst_50 = arith.constant dense<0.000000e+00> : vector<8x128xf32>
    %84 = tpu.matmul %83, %81, %cst_50 {dimension_numbers = #tpu.dot_dimension_numbers<[1], [0], [0], [1], [0, 0, 1, 1], [], []>} : vector<8x8xf32>, vector<8x128xf32>, vector<8x128xf32> -> vector<8x128xf32>
    %85 = arith.addf %78, %84 : vector<8x128xf32>
    %c2 = arith.constant 2 : index
    %c0_51 = arith.constant 0 : index
    %86 = vector.load %arg9[%c2, %c0_51] : memref<9x128xf32, #tpu.memory_space<vmem>>, vector<1x128xf32>
    %c0_52 = arith.constant 0 : index
    %c57 = arith.constant 57 : index
    %87 = vector.load %arg11[%c0_52, %c57] : memref<8x384xf32, #tpu.memory_space<vmem>>, vector<8x128xf32>
    %88 = vector.broadcast %86 : vector<1x128xf32> to vector<8x128xf32>
    %89 = arith.mulf %87, %88 : vector<8x128xf32>
    %c2_53 = arith.constant 2 : index
    %c0_54 = arith.constant 0 : index
    %c0_55 = arith.constant 0 : index
    %90 = vector.load %arg7[%c2_53, %c0_54, %c0_55] : memref<27x8x8xf32, #tpu.memory_space<vmem>>, vector<1x8x8xf32>
    %91 = vector.shape_cast %90 : vector<1x8x8xf32> to vector<8x8xf32>
    %cst_56 = arith.constant dense<0.000000e+00> : vector<8x128xf32>
    %92 = tpu.matmul %91, %89, %cst_56 {dimension_numbers = #tpu.dot_dimension_numbers<[1], [0], [0], [1], [0, 0, 1, 1], [], []>} : vector<8x8xf32>, vector<8x128xf32>, vector<8x128xf32> -> vector<8x128xf32>
    %93 = arith.addf %85, %92 : vector<8x128xf32>
    %c0_57 = arith.constant 0 : index
    %c121 = arith.constant 121 : index
    %94 = vector.load %arg11[%c0_57, %c121] : memref<8x384xf32, #tpu.memory_space<vmem>>, vector<8x128xf32>
    %95 = vector.broadcast %86 : vector<1x128xf32> to vector<8x128xf32>
    %96 = arith.mulf %94, %95 : vector<8x128xf32>
    %c11 = arith.constant 11 : index
    %c0_58 = arith.constant 0 : index
    %c0_59 = arith.constant 0 : index
    %97 = vector.load %arg7[%c11, %c0_58, %c0_59] : memref<27x8x8xf32, #tpu.memory_space<vmem>>, vector<1x8x8xf32>
    %98 = vector.shape_cast %97 : vector<1x8x8xf32> to vector<8x8xf32>
    %cst_60 = arith.constant dense<0.000000e+00> : vector<8x128xf32>
    %99 = tpu.matmul %98, %96, %cst_60 {dimension_numbers = #tpu.dot_dimension_numbers<[1], [0], [0], [1], [0, 0, 1, 1], [], []>} : vector<8x8xf32>, vector<8x128xf32>, vector<8x128xf32> -> vector<8x128xf32>
    %100 = arith.addf %93, %99 : vector<8x128xf32>
    %c0_61 = arith.constant 0 : index
    %c185 = arith.constant 185 : index
    %101 = vector.load %arg11[%c0_61, %c185] : memref<8x384xf32, #tpu.memory_space<vmem>>, vector<8x128xf32>
    %102 = vector.broadcast %86 : vector<1x128xf32> to vector<8x128xf32>
    %103 = arith.mulf %101, %102 : vector<8x128xf32>
    %c20 = arith.constant 20 : index
    %c0_62 = arith.constant 0 : index
    %c0_63 = arith.constant 0 : index
    %104 = vector.load %arg7[%c20, %c0_62, %c0_63] : memref<27x8x8xf32, #tpu.memory_space<vmem>>, vector<1x8x8xf32>
    %105 = vector.shape_cast %104 : vector<1x8x8xf32> to vector<8x8xf32>
    %cst_64 = arith.constant dense<0.000000e+00> : vector<8x128xf32>
    %106 = tpu.matmul %105, %103, %cst_64 {dimension_numbers = #tpu.dot_dimension_numbers<[1], [0], [0], [1], [0, 0, 1, 1], [], []>} : vector<8x8xf32>, vector<8x128xf32>, vector<8x128xf32> -> vector<8x128xf32>
    %107 = arith.addf %100, %106 : vector<8x128xf32>
    %c3 = arith.constant 3 : index
    %c0_65 = arith.constant 0 : index
    %108 = vector.load %arg9[%c3, %c0_65] : memref<9x128xf32, #tpu.memory_space<vmem>>, vector<1x128xf32>
    %c0_66 = arith.constant 0 : index
    %c63 = arith.constant 63 : index
    %109 = vector.load %arg11[%c0_66, %c63] : memref<8x384xf32, #tpu.memory_space<vmem>>, vector<8x128xf32>
    %110 = vector.broadcast %108 : vector<1x128xf32> to vector<8x128xf32>
    %111 = arith.mulf %109, %110 : vector<8x128xf32>
    %c3_67 = arith.constant 3 : index
    %c0_68 = arith.constant 0 : index
    %c0_69 = arith.constant 0 : index
    %112 = vector.load %arg7[%c3_67, %c0_68, %c0_69] : memref<27x8x8xf32, #tpu.memory_space<vmem>>, vector<1x8x8xf32>
    %113 = vector.shape_cast %112 : vector<1x8x8xf32> to vector<8x8xf32>
    %cst_70 = arith.constant dense<0.000000e+00> : vector<8x128xf32>
    %114 = tpu.matmul %113, %111, %cst_70 {dimension_numbers = #tpu.dot_dimension_numbers<[1], [0], [0], [1], [0, 0, 1, 1], [], []>} : vector<8x8xf32>, vector<8x128xf32>, vector<8x128xf32> -> vector<8x128xf32>
    %115 = arith.addf %107, %114 : vector<8x128xf32>
    %c0_71 = arith.constant 0 : index
    %c127 = arith.constant 127 : index
    %116 = vector.load %arg11[%c0_71, %c127] : memref<8x384xf32, #tpu.memory_space<vmem>>, vector<8x128xf32>
    %117 = vector.broadcast %108 : vector<1x128xf32> to vector<8x128xf32>
    %118 = arith.mulf %116, %117 : vector<8x128xf32>
    %c12 = arith.constant 12 : index
    %c0_72 = arith.constant 0 : index
    %c0_73 = arith.constant 0 : index
    %119 = vector.load %arg7[%c12, %c0_72, %c0_73] : memref<27x8x8xf32, #tpu.memory_space<vmem>>, vector<1x8x8xf32>
    %120 = vector.shape_cast %119 : vector<1x8x8xf32> to vector<8x8xf32>
    %cst_74 = arith.constant dense<0.000000e+00> : vector<8x128xf32>
    %121 = tpu.matmul %120, %118, %cst_74 {dimension_numbers = #tpu.dot_dimension_numbers<[1], [0], [0], [1], [0, 0, 1, 1], [], []>} : vector<8x8xf32>, vector<8x128xf32>, vector<8x128xf32> -> vector<8x128xf32>
    %122 = arith.addf %115, %121 : vector<8x128xf32>
    %c0_75 = arith.constant 0 : index
    %c191 = arith.constant 191 : index
    %123 = vector.load %arg11[%c0_75, %c191] : memref<8x384xf32, #tpu.memory_space<vmem>>, vector<8x128xf32>
    %124 = vector.broadcast %108 : vector<1x128xf32> to vector<8x128xf32>
    %125 = arith.mulf %123, %124 : vector<8x128xf32>
    %c21 = arith.constant 21 : index
    %c0_76 = arith.constant 0 : index
    %c0_77 = arith.constant 0 : index
    %126 = vector.load %arg7[%c21, %c0_76, %c0_77] : memref<27x8x8xf32, #tpu.memory_space<vmem>>, vector<1x8x8xf32>
    %127 = vector.shape_cast %126 : vector<1x8x8xf32> to vector<8x8xf32>
    %cst_78 = arith.constant dense<0.000000e+00> : vector<8x128xf32>
    %128 = tpu.matmul %127, %125, %cst_78 {dimension_numbers = #tpu.dot_dimension_numbers<[1], [0], [0], [1], [0, 0, 1, 1], [], []>} : vector<8x8xf32>, vector<8x128xf32>, vector<8x128xf32> -> vector<8x128xf32>
    %129 = arith.addf %122, %128 : vector<8x128xf32>
    %c0_79 = arith.constant 0 : index
    %c64_80 = arith.constant 64 : index
    %130 = vector.load %arg11[%c0_79, %c64_80] : memref<8x384xf32, #tpu.memory_space<vmem>>, vector<8x128xf32>
    %c4 = arith.constant 4 : index
    %c0_81 = arith.constant 0 : index
    %c0_82 = arith.constant 0 : index
    %131 = vector.load %arg7[%c4, %c0_81, %c0_82] : memref<27x8x8xf32, #tpu.memory_space<vmem>>, vector<1x8x8xf32>
    %132 = vector.shape_cast %131 : vector<1x8x8xf32> to vector<8x8xf32>
    %cst_83 = arith.constant dense<0.000000e+00> : vector<8x128xf32>
    %133 = tpu.matmul %132, %130, %cst_83 {dimension_numbers = #tpu.dot_dimension_numbers<[1], [0], [0], [1], [0, 0, 1, 1], [], []>} : vector<8x8xf32>, vector<8x128xf32>, vector<8x128xf32> -> vector<8x128xf32>
    %134 = arith.addf %129, %133 : vector<8x128xf32>
    %c13 = arith.constant 13 : index
    %c0_84 = arith.constant 0 : index
    %c0_85 = arith.constant 0 : index
    %135 = vector.load %arg7[%c13, %c0_84, %c0_85] : memref<27x8x8xf32, #tpu.memory_space<vmem>>, vector<1x8x8xf32>
    %136 = vector.shape_cast %135 : vector<1x8x8xf32> to vector<8x8xf32>
    %cst_86 = arith.constant dense<0.000000e+00> : vector<8x128xf32>
    %137 = tpu.matmul %136, %13, %cst_86 {dimension_numbers = #tpu.dot_dimension_numbers<[1], [0], [0], [1], [0, 0, 1, 1], [], []>} : vector<8x8xf32>, vector<8x128xf32>, vector<8x128xf32> -> vector<8x128xf32>
    %138 = arith.addf %134, %137 : vector<8x128xf32>
    %c0_87 = arith.constant 0 : index
    %c192 = arith.constant 192 : index
    %139 = vector.load %arg11[%c0_87, %c192] : memref<8x384xf32, #tpu.memory_space<vmem>>, vector<8x128xf32>
    %c22 = arith.constant 22 : index
    %c0_88 = arith.constant 0 : index
    %c0_89 = arith.constant 0 : index
    %140 = vector.load %arg7[%c22, %c0_88, %c0_89] : memref<27x8x8xf32, #tpu.memory_space<vmem>>, vector<1x8x8xf32>
    %141 = vector.shape_cast %140 : vector<1x8x8xf32> to vector<8x8xf32>
    %cst_90 = arith.constant dense<0.000000e+00> : vector<8x128xf32>
    %142 = tpu.matmul %141, %139, %cst_90 {dimension_numbers = #tpu.dot_dimension_numbers<[1], [0], [0], [1], [0, 0, 1, 1], [], []>} : vector<8x8xf32>, vector<8x128xf32>, vector<8x128xf32> -> vector<8x128xf32>
    %143 = arith.addf %138, %142 : vector<8x128xf32>
    %c5 = arith.constant 5 : index
    %c0_91 = arith.constant 0 : index
    %144 = vector.load %arg9[%c5, %c0_91] : memref<9x128xf32, #tpu.memory_space<vmem>>, vector<1x128xf32>
    %c0_92 = arith.constant 0 : index
    %c65 = arith.constant 65 : index
    %145 = vector.load %arg11[%c0_92, %c65] : memref<8x384xf32, #tpu.memory_space<vmem>>, vector<8x128xf32>
    %146 = vector.broadcast %144 : vector<1x128xf32> to vector<8x128xf32>
    %147 = arith.mulf %145, %146 : vector<8x128xf32>
    %c5_93 = arith.constant 5 : index
    %c0_94 = arith.constant 0 : index
    %c0_95 = arith.constant 0 : index
    %148 = vector.load %arg7[%c5_93, %c0_94, %c0_95] : memref<27x8x8xf32, #tpu.memory_space<vmem>>, vector<1x8x8xf32>
    %149 = vector.shape_cast %148 : vector<1x8x8xf32> to vector<8x8xf32>
    %cst_96 = arith.constant dense<0.000000e+00> : vector<8x128xf32>
    %150 = tpu.matmul %149, %147, %cst_96 {dimension_numbers = #tpu.dot_dimension_numbers<[1], [0], [0], [1], [0, 0, 1, 1], [], []>} : vector<8x8xf32>, vector<8x128xf32>, vector<8x128xf32> -> vector<8x128xf32>
    %151 = arith.addf %143, %150 : vector<8x128xf32>
    %c0_97 = arith.constant 0 : index
    %c129 = arith.constant 129 : index
    %152 = vector.load %arg11[%c0_97, %c129] : memref<8x384xf32, #tpu.memory_space<vmem>>, vector<8x128xf32>
    %153 = vector.broadcast %144 : vector<1x128xf32> to vector<8x128xf32>
    %154 = arith.mulf %152, %153 : vector<8x128xf32>
    %c14 = arith.constant 14 : index
    %c0_98 = arith.constant 0 : index
    %c0_99 = arith.constant 0 : index
    %155 = vector.load %arg7[%c14, %c0_98, %c0_99] : memref<27x8x8xf32, #tpu.memory_space<vmem>>, vector<1x8x8xf32>
    %156 = vector.shape_cast %155 : vector<1x8x8xf32> to vector<8x8xf32>
    %cst_100 = arith.constant dense<0.000000e+00> : vector<8x128xf32>
    %157 = tpu.matmul %156, %154, %cst_100 {dimension_numbers = #tpu.dot_dimension_numbers<[1], [0], [0], [1], [0, 0, 1, 1], [], []>} : vector<8x8xf32>, vector<8x128xf32>, vector<8x128xf32> -> vector<8x128xf32>
    %158 = arith.addf %151, %157 : vector<8x128xf32>
    %c0_101 = arith.constant 0 : index
    %c193 = arith.constant 193 : index
    %159 = vector.load %arg11[%c0_101, %c193] : memref<8x384xf32, #tpu.memory_space<vmem>>, vector<8x128xf32>
    %160 = vector.broadcast %144 : vector<1x128xf32> to vector<8x128xf32>
    %161 = arith.mulf %159, %160 : vector<8x128xf32>
    %c23 = arith.constant 23 : index
    %c0_102 = arith.constant 0 : index
    %c0_103 = arith.constant 0 : index
    %162 = vector.load %arg7[%c23, %c0_102, %c0_103] : memref<27x8x8xf32, #tpu.memory_space<vmem>>, vector<1x8x8xf32>
    %163 = vector.shape_cast %162 : vector<1x8x8xf32> to vector<8x8xf32>
    %cst_104 = arith.constant dense<0.000000e+00> : vector<8x128xf32>
    %164 = tpu.matmul %163, %161, %cst_104 {dimension_numbers = #tpu.dot_dimension_numbers<[1], [0], [0], [1], [0, 0, 1, 1], [], []>} : vector<8x8xf32>, vector<8x128xf32>, vector<8x128xf32> -> vector<8x128xf32>
    %165 = arith.addf %158, %164 : vector<8x128xf32>
    %c6 = arith.constant 6 : index
    %c0_105 = arith.constant 0 : index
    %166 = vector.load %arg9[%c6, %c0_105] : memref<9x128xf32, #tpu.memory_space<vmem>>, vector<1x128xf32>
    %c0_106 = arith.constant 0 : index
    %c71 = arith.constant 71 : index
    %167 = vector.load %arg11[%c0_106, %c71] : memref<8x384xf32, #tpu.memory_space<vmem>>, vector<8x128xf32>
    %168 = vector.broadcast %166 : vector<1x128xf32> to vector<8x128xf32>
    %169 = arith.mulf %167, %168 : vector<8x128xf32>
    %c6_107 = arith.constant 6 : index
    %c0_108 = arith.constant 0 : index
    %c0_109 = arith.constant 0 : index
    %170 = vector.load %arg7[%c6_107, %c0_108, %c0_109] : memref<27x8x8xf32, #tpu.memory_space<vmem>>, vector<1x8x8xf32>
    %171 = vector.shape_cast %170 : vector<1x8x8xf32> to vector<8x8xf32>
    %cst_110 = arith.constant dense<0.000000e+00> : vector<8x128xf32>
    %172 = tpu.matmul %171, %169, %cst_110 {dimension_numbers = #tpu.dot_dimension_numbers<[1], [0], [0], [1], [0, 0, 1, 1], [], []>} : vector<8x8xf32>, vector<8x128xf32>, vector<8x128xf32> -> vector<8x128xf32>
    %173 = arith.addf %165, %172 : vector<8x128xf32>
    %c0_111 = arith.constant 0 : index
    %c135 = arith.constant 135 : index
    %174 = vector.load %arg11[%c0_111, %c135] : memref<8x384xf32, #tpu.memory_space<vmem>>, vector<8x128xf32>
    %175 = vector.broadcast %166 : vector<1x128xf32> to vector<8x128xf32>
    %176 = arith.mulf %174, %175 : vector<8x128xf32>
    %c15 = arith.constant 15 : index
    %c0_112 = arith.constant 0 : index
    %c0_113 = arith.constant 0 : index
    %177 = vector.load %arg7[%c15, %c0_112, %c0_113] : memref<27x8x8xf32, #tpu.memory_space<vmem>>, vector<1x8x8xf32>
    %178 = vector.shape_cast %177 : vector<1x8x8xf32> to vector<8x8xf32>
    %cst_114 = arith.constant dense<0.000000e+00> : vector<8x128xf32>
    %179 = tpu.matmul %178, %176, %cst_114 {dimension_numbers = #tpu.dot_dimension_numbers<[1], [0], [0], [1], [0, 0, 1, 1], [], []>} : vector<8x8xf32>, vector<8x128xf32>, vector<8x128xf32> -> vector<8x128xf32>
    %180 = arith.addf %173, %179 : vector<8x128xf32>
    %c0_115 = arith.constant 0 : index
    %c199 = arith.constant 199 : index
    %181 = vector.load %arg11[%c0_115, %c199] : memref<8x384xf32, #tpu.memory_space<vmem>>, vector<8x128xf32>
    %182 = vector.broadcast %166 : vector<1x128xf32> to vector<8x128xf32>
    %183 = arith.mulf %181, %182 : vector<8x128xf32>
    %c24 = arith.constant 24 : index
    %c0_116 = arith.constant 0 : index
    %c0_117 = arith.constant 0 : index
    %184 = vector.load %arg7[%c24, %c0_116, %c0_117] : memref<27x8x8xf32, #tpu.memory_space<vmem>>, vector<1x8x8xf32>
    %185 = vector.shape_cast %184 : vector<1x8x8xf32> to vector<8x8xf32>
    %cst_118 = arith.constant dense<0.000000e+00> : vector<8x128xf32>
    %186 = tpu.matmul %185, %183, %cst_118 {dimension_numbers = #tpu.dot_dimension_numbers<[1], [0], [0], [1], [0, 0, 1, 1], [], []>} : vector<8x8xf32>, vector<8x128xf32>, vector<8x128xf32> -> vector<8x128xf32>
    %187 = arith.addf %180, %186 : vector<8x128xf32>
    %c7 = arith.constant 7 : index
    %c0_119 = arith.constant 0 : index
    %188 = vector.load %arg9[%c7, %c0_119] : memref<9x128xf32, #tpu.memory_space<vmem>>, vector<1x128xf32>
    %c0_120 = arith.constant 0 : index
    %c72 = arith.constant 72 : index
    %189 = vector.load %arg11[%c0_120, %c72] : memref<8x384xf32, #tpu.memory_space<vmem>>, vector<8x128xf32>
    %190 = vector.broadcast %188 : vector<1x128xf32> to vector<8x128xf32>
    %191 = arith.mulf %189, %190 : vector<8x128xf32>
    %c7_121 = arith.constant 7 : index
    %c0_122 = arith.constant 0 : index
    %c0_123 = arith.constant 0 : index
    %192 = vector.load %arg7[%c7_121, %c0_122, %c0_123] : memref<27x8x8xf32, #tpu.memory_space<vmem>>, vector<1x8x8xf32>
    %193 = vector.shape_cast %192 : vector<1x8x8xf32> to vector<8x8xf32>
    %cst_124 = arith.constant dense<0.000000e+00> : vector<8x128xf32>
    %194 = tpu.matmul %193, %191, %cst_124 {dimension_numbers = #tpu.dot_dimension_numbers<[1], [0], [0], [1], [0, 0, 1, 1], [], []>} : vector<8x8xf32>, vector<8x128xf32>, vector<8x128xf32> -> vector<8x128xf32>
    %195 = arith.addf %187, %194 : vector<8x128xf32>
    %c0_125 = arith.constant 0 : index
    %c136 = arith.constant 136 : index
    %196 = vector.load %arg11[%c0_125, %c136] : memref<8x384xf32, #tpu.memory_space<vmem>>, vector<8x128xf32>
    %197 = vector.broadcast %188 : vector<1x128xf32> to vector<8x128xf32>
    %198 = arith.mulf %196, %197 : vector<8x128xf32>
    %c16 = arith.constant 16 : index
    %c0_126 = arith.constant 0 : index
    %c0_127 = arith.constant 0 : index
    %199 = vector.load %arg7[%c16, %c0_126, %c0_127] : memref<27x8x8xf32, #tpu.memory_space<vmem>>, vector<1x8x8xf32>
    %200 = vector.shape_cast %199 : vector<1x8x8xf32> to vector<8x8xf32>
    %cst_128 = arith.constant dense<0.000000e+00> : vector<8x128xf32>
    %201 = tpu.matmul %200, %198, %cst_128 {dimension_numbers = #tpu.dot_dimension_numbers<[1], [0], [0], [1], [0, 0, 1, 1], [], []>} : vector<8x8xf32>, vector<8x128xf32>, vector<8x128xf32> -> vector<8x128xf32>
    %202 = arith.addf %195, %201 : vector<8x128xf32>
    %c0_129 = arith.constant 0 : index
    %c200 = arith.constant 200 : index
    %203 = vector.load %arg11[%c0_129, %c200] : memref<8x384xf32, #tpu.memory_space<vmem>>, vector<8x128xf32>
    %204 = vector.broadcast %188 : vector<1x128xf32> to vector<8x128xf32>
    %205 = arith.mulf %203, %204 : vector<8x128xf32>
    %c25 = arith.constant 25 : index
    %c0_130 = arith.constant 0 : index
    %c0_131 = arith.constant 0 : index
    %206 = vector.load %arg7[%c25, %c0_130, %c0_131] : memref<27x8x8xf32, #tpu.memory_space<vmem>>, vector<1x8x8xf32>
    %207 = vector.shape_cast %206 : vector<1x8x8xf32> to vector<8x8xf32>
    %cst_132 = arith.constant dense<0.000000e+00> : vector<8x128xf32>
    %208 = tpu.matmul %207, %205, %cst_132 {dimension_numbers = #tpu.dot_dimension_numbers<[1], [0], [0], [1], [0, 0, 1, 1], [], []>} : vector<8x8xf32>, vector<8x128xf32>, vector<8x128xf32> -> vector<8x128xf32>
    %209 = arith.addf %202, %208 : vector<8x128xf32>
    %c8 = arith.constant 8 : index
    %c0_133 = arith.constant 0 : index
    %210 = vector.load %arg9[%c8, %c0_133] : memref<9x128xf32, #tpu.memory_space<vmem>>, vector<1x128xf32>
    %c0_134 = arith.constant 0 : index
    %c73 = arith.constant 73 : index
    %211 = vector.load %arg11[%c0_134, %c73] : memref<8x384xf32, #tpu.memory_space<vmem>>, vector<8x128xf32>
    %212 = vector.broadcast %210 : vector<1x128xf32> to vector<8x128xf32>
    %213 = arith.mulf %211, %212 : vector<8x128xf32>
    %c8_135 = arith.constant 8 : index
    %c0_136 = arith.constant 0 : index
    %c0_137 = arith.constant 0 : index
    %214 = vector.load %arg7[%c8_135, %c0_136, %c0_137] : memref<27x8x8xf32, #tpu.memory_space<vmem>>, vector<1x8x8xf32>
    %215 = vector.shape_cast %214 : vector<1x8x8xf32> to vector<8x8xf32>
    %cst_138 = arith.constant dense<0.000000e+00> : vector<8x128xf32>
    %216 = tpu.matmul %215, %213, %cst_138 {dimension_numbers = #tpu.dot_dimension_numbers<[1], [0], [0], [1], [0, 0, 1, 1], [], []>} : vector<8x8xf32>, vector<8x128xf32>, vector<8x128xf32> -> vector<8x128xf32>
    %217 = arith.addf %209, %216 : vector<8x128xf32>
    %c0_139 = arith.constant 0 : index
    %c137 = arith.constant 137 : index
    %218 = vector.load %arg11[%c0_139, %c137] : memref<8x384xf32, #tpu.memory_space<vmem>>, vector<8x128xf32>
    %219 = vector.broadcast %210 : vector<1x128xf32> to vector<8x128xf32>
    %220 = arith.mulf %218, %219 : vector<8x128xf32>
    %c17 = arith.constant 17 : index
    %c0_140 = arith.constant 0 : index
    %c0_141 = arith.constant 0 : index
    %221 = vector.load %arg7[%c17, %c0_140, %c0_141] : memref<27x8x8xf32, #tpu.memory_space<vmem>>, vector<1x8x8xf32>
    %222 = vector.shape_cast %221 : vector<1x8x8xf32> to vector<8x8xf32>
    %cst_142 = arith.constant dense<0.000000e+00> : vector<8x128xf32>
    %223 = tpu.matmul %222, %220, %cst_142 {dimension_numbers = #tpu.dot_dimension_numbers<[1], [0], [0], [1], [0, 0, 1, 1], [], []>} : vector<8x8xf32>, vector<8x128xf32>, vector<8x128xf32> -> vector<8x128xf32>
    %224 = arith.addf %217, %223 : vector<8x128xf32>
    %c0_143 = arith.constant 0 : index
    %c201 = arith.constant 201 : index
    %225 = vector.load %arg11[%c0_143, %c201] : memref<8x384xf32, #tpu.memory_space<vmem>>, vector<8x128xf32>
    %226 = vector.broadcast %210 : vector<1x128xf32> to vector<8x128xf32>
    %227 = arith.mulf %225, %226 : vector<8x128xf32>
    %c26 = arith.constant 26 : index
    %c0_144 = arith.constant 0 : index
    %c0_145 = arith.constant 0 : index
    %228 = vector.load %arg7[%c26, %c0_144, %c0_145] : memref<27x8x8xf32, #tpu.memory_space<vmem>>, vector<1x8x8xf32>
    %229 = vector.shape_cast %228 : vector<1x8x8xf32> to vector<8x8xf32>
    %cst_146 = arith.constant dense<0.000000e+00> : vector<8x128xf32>
    %230 = tpu.matmul %229, %227, %cst_146 {dimension_numbers = #tpu.dot_dimension_numbers<[1], [0], [0], [1], [0, 0, 1, 1], [], []>} : vector<8x8xf32>, vector<8x128xf32>, vector<8x128xf32> -> vector<8x128xf32>
    %231 = arith.addf %224, %230 : vector<8x128xf32>
    %c0_147 = arith.constant 0 : index
    %c0_148 = arith.constant 0 : index
    %232 = vector.load %arg8[%c0_147, %c0_148] : memref<8x1xf32, #tpu.memory_space<vmem>>, vector<8x1xf32>
    %233 = vector.broadcast %232 : vector<8x1xf32> to vector<8x128xf32>
    %234 = arith.addf %231, %233 : vector<8x128xf32>
    %c0_149 = arith.constant 0 : index
    %c0_150 = arith.constant 0 : index
    %c0_151 = arith.constant 0 : index
    %235 = vector.load %arg10[%c0_149, %c0_150, %c0_151] : memref<1x8x128xf32, #tpu.memory_space<vmem>>, vector<1x8x128xf32>
    %236 = vector.shape_cast %235 : vector<1x8x128xf32> to vector<8x128xf32>
    %237 = vector.shape_cast %234 : vector<8x128xf32> to vector<1x8x128xf32>
    tpu.vector_store %arg10[%c0_149, %c0_150, %c0_151], %237 {strides = array<i32>} : memref<1x8x128xf32, #tpu.memory_space<vmem>>, vector<1x8x128xf32>,
    return
  }
  func.func @transform_0(%arg0: i32, %arg1: i32) -> (i32, i32, i32) {
    %c0_i32 = arith.constant 0 : i32
    %c0_i32_0 = arith.constant 0 : i32
    return %arg0, %c0_i32, %arg1 : i32, i32, i32
  }
  func.func @transform_1(%arg0: i32, %arg1: i32) -> (i32, i32, i32) {
    %c1_i32 = arith.constant 1 : i32
    %0 = arith.subi %arg1, %c1_i32 : i32
    %c0_i32 = arith.constant 0 : i32
    %1 = arith.maxsi %0, %c0_i32 : i32
    %c0_i32_0 = arith.constant 0 : i32
    %c0_i32_1 = arith.constant 0 : i32
    return %arg0, %c0_i32_0, %1 : i32, i32, i32
  }
  func.func @transform_2(%arg0: i32, %arg1: i32) -> (i32, i32, i32) {
    %c1_i32 = arith.constant 1 : i32
    %0 = arith.addi %arg1, %c1_i32 : i32
    %c1_i32_0 = arith.constant 1 : i32
    %1 = arith.minsi %0, %c1_i32_0 : i32
    %c0_i32 = arith.constant 0 : i32
    %c0_i32_1 = arith.constant 0 : i32
    return %arg0, %c0_i32, %1 : i32, i32, i32
  }
  func.func @transform_3(%arg0: i32, %arg1: i32) -> (i32, i32) {
    %c0_i32 = arith.constant 0 : i32
    %c0_i32_0 = arith.constant 0 : i32
    %c0_i32_1 = arith.constant 0 : i32
    return %c0_i32, %c0_i32_0 : i32, i32
  }
  func.func @transform_4(%arg0: i32, %arg1: i32) -> (i32, i32) {
    %c0_i32 = arith.constant 0 : i32
    %c0_i32_0 = arith.constant 0 : i32
    %c0_i32_1 = arith.constant 0 : i32
    return %c0_i32, %c0_i32_0 : i32, i32
  }
  func.func @transform_5(%arg0: i32, %arg1: i32) -> (i32, i32, i32) {
    %c0_i32 = arith.constant 0 : i32
    %c0_i32_0 = arith.constant 0 : i32
    %c0_i32_1 = arith.constant 0 : i32
    %c0_i32_2 = arith.constant 0 : i32
    return %c0_i32, %c0_i32_0, %c0_i32_1 : i32, i32, i32
  }
  func.func @transform_6(%arg0: i32, %arg1: i32) -> (i32, i32) {
    %c0_i32 = arith.constant 0 : i32
    %c0_i32_0 = arith.constant 0 : i32
    %c0_i32_1 = arith.constant 0 : i32
    return %c0_i32, %c0_i32_0 : i32, i32
  }
  func.func @transform_7(%arg0: i32, %arg1: i32) -> (i32, i32) {
    %c0_i32 = arith.constant 0 : i32
    %c0_i32_0 = arith.constant 0 : i32
    %c0_i32_1 = arith.constant 0 : i32
    return %c0_i32, %c0_i32_0 : i32, i32
  }
  func.func @transform_8(%arg0: i32, %arg1: i32) -> (i32, i32, i32) {
    %c0_i32 = arith.constant 0 : i32
    %c0_i32_0 = arith.constant 0 : i32
    return %arg0, %c0_i32, %arg1 : i32, i32, i32
  }
}

</mosaic_0001>

<bundles_post_ra>
// kernel: conv3d_forward.1
= control target key start
LH: loop header
LB: loop body
LE: loop exit
PB: predicated region body
PF: predicated region fallthrough
CT: control target
= control target key end

     0   :  { %s3477_s27 = smov 0   ;;  %s3479_s28 = smov 0   ;;  %s3987_s0 = inlined_call_operand.vmem [shape: f32[2,8,256], index: 0, kind: input, shape index: {}, may-alias: {0,1,2}]   ;;  %s3988_s1 = inlined_call_operand.vmem [shape: f32[2,8,256], index: 1, kind: input, shape index: {}, may-alias: {0,1,2}]   ;;  %s3989_s2 = inlined_call_operand.vmem [shape: f32[2,8,256], index: 2, kind: input, shape index: {}, may-alias: {0,1,2}]   ;;  %s3990_s3 = inlined_call_operand.vmem [shape: f32[8,1], index: 3, kind: input, shape index: {}]   ;;  %s3991_s4 = inlined_call_operand.vmem [shape: f32[8,1], index: 4, kind: input, shape index: {}]   ;;  %s3992_s5 = inlined_call_operand.vmem [shape: f32[27,8,8], index: 5, kind: input, shape index: {}]   ;;  %s3993_s6 = inlined_call_operand.vmem [shape: f32[8,1], index: 6, kind: input, shape index: {}]   ;;  %s3994_s7 = inlined_call_operand.vmem [shape: f32[9,128], index: 7, kind: input, shape index: {}]   ;;  %s3995_s8 = inlined_call_operand.vmem [shape: f32[2,8,256], index: 8, kind: output, shape index: {}]  }
   0x1   :  { %4028 = sst [smem:[#allocation3_spill]] %s3990_s3  ;;  %s3481_s29 = smov 0  }
   0x2   :  { %4029 = sst [smem:[#allocation4_spill]] %s3991_s4  ;;  %s3483_s30 = smov 0  }
   0x3   :  { %s3485_s9 = smov 0  }
   0x4 LB: > { %s27_s10 = sadd.s32 1, %s3402_s29  ;;  %s30_s11 = sadd.s32 1, %s3406_s30  ;;  %s3410_s9 = sphi %s3485_s9, %s18_s9   ;;  %s3406_s30 = sphi %s3483_s30, %s4051_s30   ;;  %s3402_s29 = sphi %s3481_s29, %s4050_s29   ;;  %s3398_s28 = sphi %s3479_s28, %s4049_s28   ;;  %s3394_s27 = sphi %s3477_s27, %s4048_s27  }
   0x5   : > { %p28_p0 = scmp.ge.s32.totalorder %s27_s10, 2  ;;  %p3039_p1 = scmp.ge.s32.totalorder %s3410_s9, 1 }
   0x6   : > { %p335_p2 = scmp.lt.s32.totalorder %s3410_s9, 5 }
   0x7   : > { %s4053_s10 = smov (%p28_p0, %s27_s10), 0  ;;  %s4055_s11 = smov (!%p28_p0, %s30_s11), %s3406_s30 }
   0x8   : > { %p336_p3 = pnand %p3039_p1, %p335_p2  ;;  %p32_p4 = scmp.ge.s32.totalorder %s4055_s11, 2 }
   0x9   : > { %v3057_v0 = vld [vmem:[%s3994_s7] ss:$0 sm:$0xff] (!%p336_p3)  ;;  %s4030_s3 = sld [smem:[#allocation3_spill]] (!%p336_p3)  ;;  %s3996_s16 = smov (!%p336_p3), 119   ;;  %v3413_v2 = vmov (!%p336_p3), 0   ;;  %vm443_vm0 = vcmask (!%p336_p3), 523264  }
   0xa   : > { %s4057_s11 = smov (%p32_p4, %s4055_s11), 0  ;;  %339 = sbr.rel (%p336_p3) target bundleno = 586 (0x24a), region = 52 }
   0xb   : > { %496 = vrot.lane.b32.xlu1 (!%p336_p3), %v3057_v0, %s3996_s16  ;;  %3371 = vset.pattern.permute.xlu0 (!%p336_p3), %v3413_v2  ;;  %s4031_s4 = sld [smem:[#allocation4_spill]] (!%p336_p3)  ;;  %s4000_s19 = smov (!%p336_p3), 55   ;;  %v3415_v4 = vmov (!%p336_p3), 0.0   ;;  %vm445_vm1 = vcmask (!%p336_p3), 1048064   ;;  %v3063_v5 = vld [vmem:[%s3994_s7 + $0x1] ss:$0 sm:$0xff] (!%p336_p3) }
   0xc   : > { %444 = vst.msk [vmem:[#allocation2] sm:$0xff] (!%p336_p3), %vm443_vm0, %v3415_v4  ;;  %3176 = vmatprep.subr.mxu0 (!%p336_p3), %v3415_v4  ;;  %3181 = vmatprep.subr.mxu1 (!%p336_p3), %v3415_v4  ;;  %s3998_s22 = smov (!%p336_p3), 120   ;;  %v3070_v6 = vld [vmem:[%s3994_s7 + $0x2] ss:$0 sm:$0xff] (!%p336_p3)  ;;  %s4002_s25 = smov (!%p336_p3), 56   ;;  %vm3431_vm2 = vmmov (!%p336_p3), 0  }
   0xd   : > { %446 = vst.msk [vmem:[#allocation2 + $0x10] sm:$0xff] (!%p336_p3), %vm445_vm1, %v3415_v4  ;;  %s4008_s26 = smov (!%p336_p3), 121   ;;  %v3077_v7 = vld [vmem:[%s3994_s7 + $0x3] ss:$0 sm:$0xff] (!%p336_p3)  ;;  %s4004_s14 = smov (!%p336_p3), 57   ;;  %3183 = vmatprep.mubr.msk.f32.mxu1 (!%p336_p3), %vm3431_vm2, %v3415_v4  ;;  %3178 = vmatprep.mubr.msk.f32.mxu0 (!%p336_p3), %vm3431_vm2, %v3415_v4  ;;  %vm509_vm3 = vcmask (!%p336_p3), 72704  }
   0xe   : > { %s4014_s15 = smov (!%p336_p3), 127   ;;  %v3090_v8 = vld [vmem:[%s3994_s7 + $0x5] ss:$0 sm:$0xff] (!%p336_p3)  ;;  %s4010_s20 = smov (!%p336_p3), 63   ;;  %v3097_v9 = vld [vmem:[%s3994_s7 + $0x6] ss:$0 sm:$0xff] (!%p336_p3) }
   0xf   : > { %v441_v1 = vld [vmem:[%s4030_s3] sm:$0xff] (!%p336_p3)  ;;  %490 = vrot.lane.b32.xlu1 (!%p336_p3), %v3057_v0, %s4000_s19  ;;  %s4006_s21 = smov (!%p336_p3), 1   ;;  %s4018_s12 = smov (!%p336_p3), 65   ;;  %v3111_v11 = vld [vmem:[%s3994_s7 + $0x8] ss:$0 sm:$0xff] (!%p336_p3)  ;;  %vm512_vm4 = vcmask (!%p336_p3), 64512  }
  0x10   : > { %450 = vperm.xlu0 (!%p336_p3), %3371, %v441_v1   ;;  %s4012_s13 = smov (!%p336_p3), 7   ;;  %v3104_v10 = vld [vmem:[%s3994_s7 + $0x7] ss:$0 sm:$0xff] (!%p336_p3)  ;;  %s4020_s16 = smov (!%p336_p3), 71   ;;  %vm592_vm5 = vcmask (!%p336_p3), 596992   ;;  %vm775_vm6 = vcmask (!%p336_p3), 588800  }
  0x11   : > { %v442_v3 = vld [vmem:[%s4031_s4] sm:$0xff]  ;;  %s4016_s23 = smov 8   ;;  %s4022_s19 = smov 72   ;;  %vm1046_vm7 = vcmask 580608   ;;  %vm1136_vm8 = vcmask 56320   ;;  %vm1318_vm9 = vcmask 531456  }
  0x12   : > { %s4026_s17 = smov 73   ;;  %s3042_s18 = sadd.s32 4294967295, %s3394_s27  ;;  %vm1408_vm10 = vcmask 7168   ;;  %vm1834_vm11 = vcmask 515072   ;;  %vm1924_vm12 = vcmask 1039360   ;;  %vm2196_vm13 = vcmask 990208  }
  0x13   : > { %852 = vrot.lane.b32.xlu1 %v3063_v5, %s3998_s22  ;;  %p397_p5 = scmp.lt.s32.totalorder %s3398_s28, 1  ;;  %p406_p6 = scmp.gt.s32.totalorder %s3042_s18, 0  ;;  %vm2106_vm14 = vcmask 465920   ;;  %vm2378_vm15 = vcmask 457728  }
  0x14   : > { %456 = vperm.xlu0 %3371, %v442_v3   ;;  %p399_p7 = scmp.lt.s32.totalorder %s3394_s27, 1  ;;  %p3043_p9 = scmp.lt.s32.totalorder %s3042_s18, 1 }
  0x15   : > { %s4059_s28 = smov (!%p397_p5, %s3398_s28), 1  ;;  %s4061_s18 = smov (!%p406_p6, %s3042_s18), 0 }
  0x16   : > { %s400_s22 = scalar_select %p399_p7, %s3394_s27, 1 }
  0x17   : > { %1123 = vrot.lane.b32.xlu1 %v3070_v6, %s4008_s26  ;;  %s3040_s24 = sshll.u32 %s4059_s28, 1  ;;  %s4065_s18 = smov (!%p3043_p9, %s4061_s18), 1 }
  0x18   : > { %762 = vrot.lane.b32.xlu0 %v3063_v5, %s4002_s25  ;;  %s4024_s25 = smov 9   ;;  %s413_s26 = sadd.s32 %s4065_s18, %s3040_s24 }
  0x19   : > { %p462_p10 = scmp.gt.s32.totalorder %s3394_s27, 0  ;;  %s4032_s4 = smov 73  }
  0x1a   : > { %s4043_s28 = smov 57  }
  0x1b   : > { %1395 = vrot.lane.b32.xlu1 %v3077_v7, %s4014_s15  ;;  %s3049_s15 = sshll.u32 %s413_s26, 3 }
  0x1c   : > { %1033 = vrot.lane.b32.xlu0 %v3070_v6, %s4004_s14  ;;  %s419_s14 = sadd.s32 1, %s3394_s27  ;;  %s415_s3 = scalar_lea.vmem %s3988_s1, %s3049_s15 }
  0x1d   : > { %p420_p8 = scmp.lt.s32.totalorder %s419_s14, 1  ;;  %v468_v15 = vld [vmem:[%s415_s3] sm:$0xff]  ;;  %s3430_s3 = smov 64  }
  0x1e   : > { %s463_s18 = scalar_select %p462_p10, 1, 0 }
  0x1f   : > { %1911 = vrot.lane.b32.xlu1 %v3090_v8, %s4006_s21  ;;  %s4063_s14 = smov (!%p420_p8, %s419_s14), 1  ;;  %s402_s21 = sadd.s32 %s3040_s24, %s400_s22 }
  0x20   : > { %1305 = vrot.lane.b32.xlu0 %v3077_v7, %s4010_s20  ;;  %s4067_s14 = smov (!%p420_p8, %s4063_s14), 1  ;;  %s464_s26 = scvt.s32.f32 %s463_s18 }
  0x21   : > { %s427_s20 = sadd.s32 %s3040_s24, %s4067_s14  ;;  %s4033_s27 = smov 9  }
  0x22   : > { %s466_s14 = scalar_select %p399_p7, 1, 0  ;;  %v472_v25 = vstv %s464_s26 }
  0x23   : > { %2183 = vrot.lane.b32.xlu1 %v3097_v9, %s4012_s13  ;;  %s3571_s13 = sshll.u32 %s402_s21, 3  ;;  %s4036_s15 = smov 65  }
  0x24   : > { %1821 = vrot.lane.b32.xlu0 %v3090_v8, %s4018_s12  ;;  %s4038_s21 = smov 127   ;;  %s4039_s12 = smov 7  }
  0x25   : > { %s4042_s24 = smov 1   ;;  %s4045_s18 = smov 55  }
  0x26   : > { %s4047_s26 = smov 119  }
  0x27   : > { %2455 = vrot.lane.b32.xlu1 %v3104_v10, %s4016_s23  ;;  %s3054_s23 = sshll.u32 %s427_s20, 3  ;;  %s4037_s20 = smov 8  }
  0x28   : > { %2093 = vrot.lane.b32.xlu0 %v3097_v9, %s4020_s16  ;;  %s429_s22 = scalar_lea.vmem %s3989_s2, %s3054_s23  ;;  %s467_s16 = scvt.s32.f32 %s466_s14 }
  0x29   : > { %v474_v16 = vld [vmem:[%s429_s22] sm:$0xff]  ;;  %s4040_s23 = smov 63   ;;  %s4044_s22 = smov 56  }
  0x2a   : > { %v478_v26 = vstv %s467_s16  ;;  %s4046_s14 = smov 120  }
  0x2b   : > { %2727 = vrot.lane.b32.xlu1 %v3111_v11, %s4024_s25  ;;  %s4035_s25 = smov 71  }
  0x2c   : > { %2365 = vrot.lane.b32.xlu0 %v3104_v10, %s4022_s19  ;;  %s404_s19 = scalar_lea.vmem %s3987_s0, %s3571_s13 }
  0x2d   : > { %v447_v14 = vld [vmem:[%s404_s19] sm:$0xff]  ;;  %s4034_s19 = smov 72  }
  0x30   : > { %2637 = vrot.lane.b32.xlu0 %v3111_v11, %s4026_s17  ;;  %s4041_s17 = smov 121  }
  0x7d   : > { %v3586_v12 = vpop.permute.xlu1 %496 }
  0x81   : > { %v3588_v24 = vpop.permute.xlu1 %490 }
  0x85   : > { %v853_v35 = vpop.permute.xlu1 %852 }
  0x89   : > { %v1124_v38 = vpop.permute.xlu1 %1123 }
  0x8d   : > { %v1396_v43 = vpop.permute.xlu1 %1395 }
  0x8f   : > { %v451_v13 = vpop.permute.xlu0 %450 }
  0x90   : > { %v453_v17 = vmul.f32 %v451_v13, %v447_v14  ;;  %v469_v18 = vmul.f32 %v468_v15, %v451_v13  ;;  %v475_v19 = vmul.f32 %v474_v16, %v451_v13 }
  0x91   : > { %v1912_v45 = vpop.permute.xlu1 %1911 }
  0x93   : > { %v457_v20 = vpop.permute.xlu0 %456 }
  0x94   : > { %v459_v21 = vadd.f32 %v457_v20, %v453_v17  ;;  %v470_v22 = vadd.f32 %v469_v18, %v457_v20  ;;  %v476_v23 = vadd.f32 %v475_v19, %v457_v20 }
  0x95   : > { %v2184_v50 = vpop.permute.xlu1 %2183 }
  0x96   : > { %v3590_v27 = vmax.f32 %v459_v21, 0.0  ;;  %v471_v28 = vmax.f32 %v470_v22, 0.0  ;;  %v477_v29 = vmax.f32 %v476_v23, 0.0 }
  0x97   : > { %v3592_v30 = vpop.permute.xlu0 %762 }
  0x98   : > { %v473_v31 = vmul.f32 %v472_v25, %v471_v28  ;;  %v479_v32 = vmul.f32 %v478_v26, %v477_v29  ;;  %1735 = vrot.lane.b32.xlu0 %v3590_v27, %s3430_s3  ;;  %1577 = vrot.lane.b32.xlu1 %v3590_v27, %s3430_s3  ;;  %v670_v33 = vmul.f32 %v3588_v24, %v3590_v27  ;;  %v2903_v25 = vld [vmem:[%s3993_s6] sm:$0xff] }
  0x99   : > { %v500_v34 = vmul.f32 %v3586_v12, %v3590_v27  ;;  %v941_v37 = vmul.f32 %v3592_v30, %v3590_v27  ;;  %v856_v42 = vmul.f32 %v853_v35, %v3590_v27  ;;  %v1914_v46 = vmul.f32 %v1912_v45, %v3590_v27  ;;  %v2456_v9 = vpop.permute.xlu1 %2455 }
  0x9a   : > { %480 = vst.msk [vmem:[#allocation2] sm:$0xff] %vm445_vm1, %v473_v31  ;;  %v1127_v47 = vmul.f32 %v1124_v38, %v3590_v27  ;;  %v2186_v51 = vmul.f32 %v2184_v50, %v3590_v27  ;;  %v1399_v52 = vmul.f32 %v1396_v43, %v3590_v27  ;;  %v2458_v11 = vmul.f32 %v2456_v9, %v3590_v27 }
  0x9b   : > { %481 = vst.msk [vmem:[#allocation2 + $0x10] sm:$0xff] %vm443_vm0, %v479_v32  ;;  %v1034_v36 = vpop.permute.xlu0 %1033  ;;  %vm2650_vm1 = vcmask 449536  }
  0x9c   : > { %676 = vrot.lane.b32.xlu0 %v670_v33, %s4032_s4  ;;  %507 = vrot.lane.b32.xlu1 %v500_v34, %s4033_s27  ;;  %v1213_v39 = vmul.f32 %v1034_v36, %v3590_v27 }
  0x9d   : > { %v2728_v19 = vpop.permute.xlu1 %2727 }
  0x9e   : > { %v2730_v20 = vmul.f32 %v2728_v19, %v3590_v27 }
  0x9f   : > { %v1306_v40 = vpop.permute.xlu0 %1305 }
  0xa0   : > { %947 = vrot.lane.b32.xlu0 %v941_v37, %s4034_s19  ;;  %590 = vrot.lane.b32.xlu1 %v670_v33, %s4032_s4  ;;  %v1485_v41 = vmul.f32 %v1306_v40, %v3590_v27 }
  0xa1   : > { %v3617_v44 = vld [vmem:[#allocation2] sm:$0xff] }
  0xa2   : > { %v3634_v55 = vld [vmem:[#allocation2 + $0x10] sm:$0xff]  ;;  %v499_v56 = vmul.f32 %v3586_v12, %v3617_v44  ;;  %v493_v57 = vmul.f32 %v3588_v24, %v3617_v44  ;;  %v765_v59 = vmul.f32 %v3592_v30, %v3617_v44  ;;  %v855_v61 = vmul.f32 %v853_v35, %v3617_v44 }
  0xa3   : > { %v1822_v48 = vpop.permute.xlu0 %1821  ;;  %v671_v62 = vmul.f32 %v3634_v55, %v3588_v24  ;;  %v1036_v63 = vmul.f32 %v1034_v36, %v3617_v44  ;;  %v942_v0 = vmul.f32 %v3592_v30, %v3634_v55  ;;  %v1126_v1 = vmul.f32 %v1124_v38, %v3617_v44 }
  0xa4   : > { %1219 = vrot.lane.b32.xlu0 %v1213_v39, %s4035_s25  ;;  %773 = vrot.lane.b32.xlu1 %v941_v37, %s4034_s19  ;;  %v2001_v49 = vmul.f32 %v1822_v48, %v3590_v27  ;;  %v1214_v2 = vmul.f32 %v1034_v36, %v3634_v55  ;;  %v1308_v3 = vmul.f32 %v1306_v40, %v3617_v44 }
  0xa5   : > { %v1486_v5 = vmul.f32 %v1306_v40, %v3634_v55  ;;  %v1398_v7 = vmul.f32 %v1396_v43, %v3617_v44  ;;  %v1915_v10 = vmul.f32 %v1912_v45, %v3634_v55  ;;  %v1824_v12 = vmul.f32 %v1822_v48, %v3617_v44 }
  0xa6   : > { %v2002_v13 = vmul.f32 %v1822_v48, %v3634_v55  ;;  %v2187_v14 = vmul.f32 %v2184_v50, %v3634_v55  ;;  %v2459_v17 = vmul.f32 %v2456_v9, %v3634_v55  ;;  %v2731_v22 = vmul.f32 %v2728_v19, %v3634_v55  ;;  %v3071_v9 = vld [vmem:[%s3992_s5 + $0x10] sm:$0xff] }
  0xa7   : > { %v2094_v53 = vpop.permute.xlu0 %2093 }
  0xa8   : > { %1491 = vrot.lane.b32.xlu0 %v1485_v41, %s4036_s15  ;;  %863 = vrot.lane.b32.xlu1 %v856_v42, %s4037_s20  ;;  %v2273_v54 = vmul.f32 %v2094_v53, %v3590_v27  ;;  %v2096_v15 = vmul.f32 %v2094_v53, %v3617_v44  ;;  %v2274_v16 = vmul.f32 %v2094_v53, %v3634_v55  ;;  %v495_v53 = vld [vmem:[%s3992_s5] sm:$0xff] }
  0xab   : > { %v2366_v58 = vpop.permute.xlu0 %2365 }
  0xac   : > { %1575 = vrot.lane.b32.xlu0 %v3617_v44, %s3430_s3  ;;  %1044 = vrot.lane.b32.xlu1 %v1213_v39, %s4035_s25  ;;  %v2369_v60 = vmul.f32 %v2366_v58, %v3590_v27  ;;  %v2368_v18 = vmul.f32 %v2366_v58, %v3617_v44  ;;  %v2546_v21 = vmul.f32 %v2366_v58, %v3634_v55 }
  0xaf   : > { %v2638_v6 = vpop.permute.xlu0 %2637 }
  0xb0   : > { %1920 = vrot.lane.b32.xlu0 %v1914_v46, %s4038_s21  ;;  %1134 = vrot.lane.b32.xlu1 %v1127_v47, %s4039_s12  ;;  %v2641_v8 = vmul.f32 %v2638_v6, %v3590_v27  ;;  %v2640_v23 = vmul.f32 %v2638_v6, %v3617_v44  ;;  %v2818_v24 = vmul.f32 %v2638_v6, %v3634_v55 }
  0xb4   : > { %2007 = vrot.lane.b32.xlu0 %v2001_v49, %s4040_s23  ;;  %1316 = vrot.lane.b32.xlu1 %v1485_v41, %s4036_s15 }
  0xb8   : > { %2192 = vrot.lane.b32.xlu0 %v2186_v51, %s4041_s17  ;;  %1406 = vrot.lane.b32.xlu1 %v1399_v52, %s4042_s24 }
  0xbc   : > { %2279 = vrot.lane.b32.xlu0 %v2273_v54, %s4043_s28  ;;  %1737 = vrot.lane.b32.xlu1 %v3634_v55, %s3430_s3 }
  0xc0   : > { %505 = vrot.lane.b32.xlu0 %v499_v56, %s4033_s27  ;;  %1832 = vrot.lane.b32.xlu1 %v2001_v49, %s4040_s23  ;;  %v3058_v49 = vld [vmem:[%s3992_s5 + $0x48] sm:$0xff] }
  0xc4   : > { %588 = vrot.lane.b32.xlu0 %v493_v57, %s4032_s4  ;;  %2104 = vrot.lane.b32.xlu1 %v2273_v54, %s4043_s28  ;;  %v3064_v57 = vld [vmem:[%s3992_s5 + $0x8] sm:$0xff] }
  0xc8   : > { %771 = vrot.lane.b32.xlu0 %v765_v59, %s4034_s19  ;;  %2376 = vrot.lane.b32.xlu1 %v2369_v60, %s4044_s22 }
  0xcc   : > { %861 = vrot.lane.b32.xlu0 %v855_v61, %s4037_s20  ;;  %678 = vrot.lane.b32.xlu1 %v671_v62, %s4032_s4  ;;  %v3061_v61 = vld [vmem:[%s3992_s5 + $0x90] sm:$0xff] }
  0xd0   : > { %1042 = vrot.lane.b32.xlu0 %v1036_v63, %s4035_s25  ;;  %949 = vrot.lane.b32.xlu1 %v942_v0, %s4034_s19  ;;  %s440_s19 = scalar_lea.vmem %s3995_s8, %s3571_s13 }
  0xd4   : > { %1132 = vrot.lane.b32.xlu0 %v1126_v1, %s4039_s12  ;;  %1221 = vrot.lane.b32.xlu1 %v1214_v2, %s4035_s25  ;;  %v3066_v2 = vld [vmem:[%s3992_s5 + $0x50] sm:$0xff] }
  0xd8   : > { %1314 = vrot.lane.b32.xlu0 %v1308_v3, %s4036_s15  ;;  %1493 = vrot.lane.b32.xlu1 %v1486_v5, %s4036_s15  ;;  %v3068_v3 = vld [vmem:[%s3992_s5 + $0x98] sm:$0xff] }
  0xdc   : > { %1404 = vrot.lane.b32.xlu0 %v1398_v7, %s4042_s24  ;;  %2648 = vrot.lane.b32.xlu1 %v2641_v8, %s4045_s18 }
  0xe0   : > { %2464 = vrot.lane.b32.xlu0 %v2458_v11, %s4046_s14  ;;  %1922 = vrot.lane.b32.xlu1 %v1915_v10, %s4038_s21  ;;  %v3073_v10 = vld [vmem:[%s3992_s5 + $0x58] sm:$0xff] }
  0xe4   : > { %1830 = vrot.lane.b32.xlu0 %v1824_v12, %s4040_s23  ;;  %2009 = vrot.lane.b32.xlu1 %v2002_v13, %s4040_s23 }
  0xe8   : > { %2551 = vrot.lane.b32.xlu0 %v2369_v60, %s4044_s22  ;;  %2194 = vrot.lane.b32.xlu1 %v2187_v14, %s4041_s17 }
  0xec   : > { %2102 = vrot.lane.b32.xlu0 %v2096_v15, %s4043_s28  ;;  %2281 = vrot.lane.b32.xlu1 %v2274_v16, %s4043_s28  ;;  %v3075_v15 = vld [vmem:[%s3992_s5 + $0xa0] sm:$0xff]  ;;  %v3078_v16 = vld [vmem:[%s3992_s5 + $0x18] sm:$0xff] }
  0xf0   : > { %2374 = vrot.lane.b32.xlu0 %v2368_v18, %s4044_s22  ;;  %2466 = vrot.lane.b32.xlu1 %v2459_v17, %s4046_s14 }
  0xf4   : > { %2736 = vrot.lane.b32.xlu0 %v2730_v20, %s4047_s26  ;;  %2553 = vrot.lane.b32.xlu1 %v2546_v21, %s4044_s22  ;;  %v3080_v21 = vld [vmem:[%s3992_s5 + $0x60] sm:$0xff] }
  0xf8   : > { %2646 = vrot.lane.b32.xlu0 %v2640_v23, %s4045_s18  ;;  %2738 = vrot.lane.b32.xlu1 %v2731_v22, %s4047_s26  ;;  %v3082_v22 = vld [vmem:[%s3992_s5 + $0xa8] sm:$0xff] }
  0xfc   : > { %2823 = vrot.lane.b32.xlu0 %v2641_v8, %s4045_s18  ;;  %2825 = vrot.lane.b32.xlu1 %v2818_v24, %s4045_s18 }
 0x100   : > { %2906 = vperm.xlu0 %3371, %v2903_v25  }
 0x10a   : > { %v3711_v26 = vpop.permute.xlu0 %1735  ;;  %v3713_v28 = vpop.permute.xlu1 %1577 }
 0x10e   : > { %v677_v29 = vpop.permute.xlu0 %676  ;;  %v508_v30 = vpop.permute.xlu1 %507 }
 0x112   : > { %v948_v31 = vpop.permute.xlu0 %947  ;;  %v591_v32 = vpop.permute.xlu1 %590 }
 0x116   : > { %v3715_v33 = vpop.permute.xlu0 %1219  ;;  %v774_v34 = vpop.permute.xlu1 %773 }
 0x11a   : > { %v3717_v35 = vpop.permute.xlu0 %1491  ;;  %v864_v36 = vpop.permute.xlu1 %863 }
 0x11e   : > { %v3719_v37 = vpop.permute.xlu0 %1575  ;;  %v1045_v38 = vpop.permute.xlu1 %1044 }
 0x11f   : > { %v1579_v24 = vsel %vm443_vm0, %v3719_v37, %v3713_v28 }
 0x122   : > { %v3721_v39 = vpop.permute.xlu0 %1920  ;;  %v3723_v40 = vpop.permute.xlu1 %1134 }
 0x126   : > { %v3725_v41 = vpop.permute.xlu0 %2007  ;;  %v3727_v42 = vpop.permute.xlu1 %1316 }
 0x12a   : > { %v3729_v43 = vpop.permute.xlu0 %2192  ;;  %v3731_v44 = vpop.permute.xlu1 %1406 }
 0x12e   : > { %v3733_v45 = vpop.permute.xlu0 %2279  ;;  %v3735_v46 = vpop.permute.xlu1 %1737 }
 0x132   : > { %v506_v47 = vpop.permute.xlu0 %505  ;;  %v3737_v48 = vpop.permute.xlu1 %1832 }
 0x133   : > { %v510_v50 = vsel %vm509_vm3, %v506_v47, %v508_v30  ;;  %v3084_v30 = vld [vmem:[%s3992_s5 + $0x20] sm:$0xff]  ;;  %v3100_v47 = vld [vmem:[%s3992_s5 + $0x78] sm:$0xff]  ;;  %vm2740_vm3 = vcmask 973824  }
 0x134   : > { %3177 = vmatpush3.msra.mxu0 %v510_v50 }
 0x135   : > { %3179 = vmatmul.mubr.msk.f32.vlgmr.msra.gmra.mrb[0].mxu0 %vm512_vm4, %v3058_v49  ;;  %3186 = vmatprep.subr.mxu0 %v3415_v4 }
 0x136   : > { %v589_v51 = vpop.permute.xlu0 %588  ;;  %v3744_v52 = vpop.permute.xlu1 %2104  ;;  %3188 = vmatprep.mubr.msk.f32.mxu0 %vm3431_vm2, %v3415_v4 }
 0x137   : > { %v593_v54 = vsel %vm592_vm5, %v589_v51, %v591_v32  ;;  %v3102_v51 = vld [vmem:[%s3992_s5 + $0xc0] sm:$0xff] }
 0x138   : > { %3182 = vmatpush3.msra.mxu1 %v593_v54 }
 0x139   : > { %3191 = vmatprep.subr.mxu1 %v3415_v4  ;;  %3184 = vmatmul.mubr.msk.f32.vlgmr.msra.gmra.mrb[0].mxu1 %vm512_vm4, %v495_v53 }
 0x13a   : > { %v772_v55 = vpop.permute.xlu0 %771  ;;  %v3754_v56 = vpop.permute.xlu1 %2376  ;;  %3193 = vmatprep.mubr.msk.f32.mxu1 %vm3431_vm2, %v3415_v4 }
 0x13b   : > { %v776_v58 = vsel %vm775_vm6, %v772_v55, %v774_v34  ;;  %v3091_v34 = vld [vmem:[%s3992_s5 + $0x28] sm:$0xff] }
 0x13c   : > { %3192 = vmatpush3.msra.mxu1 %v776_v58  ;;  %v3109_v58 = vld [vmem:[%s3992_s5 + $0xc8] sm:$0xff] }
 0x13d   : > { %3194 = vmatmul.mubr.msk.f32.vlgmr.msra.gmra.mrb[2].mxu1 %vm512_vm4, %v3064_v57  ;;  %3201 = vmatprep.subr.mxu1 %v3415_v4 }
 0x13e   : > { %v862_v59 = vpop.permute.xlu0 %861  ;;  %v679_v60 = vpop.permute.xlu1 %678  ;;  %3203 = vmatprep.mubr.msk.f32.mxu1 %vm3431_vm2, %v3415_v4 }
 0x13f   : > { %v680_v62 = vsel %vm592_vm5, %v677_v29, %v679_v60  ;;  %v865_v63 = vsel %vm512_vm4, %v862_v59, %v864_v36 }
 0x140   : > { %3187 = vmatpush3.msra.mxu0 %v680_v62 }
 0x141   : > { %3189 = vmatmul.mubr.msk.f32.vlgmr.msra.gmra.mrb[2].mxu0 %vm512_vm4, %v3061_v61  ;;  %3196 = vmatprep.subr.mxu0 %v3415_v4  ;;  %v3112_v61 = vld [vmem:[%s3992_s5 + $0x40] sm:$0xff] }
 0x142   : > { %v1043_v0 = vpop.permute.xlu0 %1042  ;;  %3197 = vmatpush3.msra.mxu0 %v865_v63  ;;  %v950_v1 = vpop.permute.xlu1 %949  ;;  %3198 = vmatprep.mubr.msk.f32.mxu0 %vm3431_vm2, %v3415_v4 }
 0x143   : > { %v1047_v5 = vsel %vm1046_vm7, %v1043_v0, %v1045_v38  ;;  %v951_v6 = vsel %vm775_vm6, %v948_v31, %v950_v1  ;;  %3206 = vmatprep.subr.mxu0 %v3415_v4  ;;  %v3086_v31 = vld [vmem:[%s3992_s5 + $0x68] sm:$0xff] }
 0x144   : > { %3202 = vmatpush3.msra.mxu1 %v951_v6  ;;  %v3114_v0 = vld [vmem:[%s3992_s5 + $0x88] sm:$0xff] }
 0x145   : > { %3199 = vmatmul.mubr.msk.f32.vlgmr.msra.gmra.mrb[4].mxu0 %vm512_vm4, %v3066_v2  ;;  %3204 = vmatmul.mubr.msk.f32.vlgmr.msra.gmra.mrb[4].mxu1 %vm512_vm4, %v3068_v3  ;;  %v3116_v3 = vld [vmem:[%s3992_s5 + $0xd0] sm:$0xff] }
 0x146   : > { %3207 = vmatpush3.msra.mxu0 %v1047_v5  ;;  %v1133_v7 = vpop.permute.xlu0 %1132  ;;  %v1222_v8 = vpop.permute.xlu1 %1221  ;;  %3211 = vmatprep.subr.mxu1 %v3415_v4 }
 0x147   : > { %v1137_v11 = vsel %vm1136_vm8, %v1133_v7, %v3723_v40  ;;  %v1223_v12 = vsel %vm1046_vm7, %v3715_v33, %v1222_v8  ;;  %3208 = vmatprep.mubr.msk.f32.mxu0 %vm3431_vm2, %v3415_v4  ;;  %3213 = vmatprep.mubr.msk.f32.mxu1 %vm3431_vm2, %v3415_v4  ;;  %v3088_v33 = vld [vmem:[%s3992_s5 + $0xb0] sm:$0xff] }
 0x148   : > { %3212 = vmatpush3.msra.mxu1 %v1137_v11  ;;  %3216 = vmatprep.subr.mxu0 %v3415_v4  ;;  %v3093_v40 = vld [vmem:[%s3992_s5 + $0x70] sm:$0xff] }
 0x149   : > { %3209 = vmatmul.mubr.msk.f32.vlgmr.msra.gmra.mrb[6].mxu0 %vm512_vm4, %v3071_v9  ;;  %3214 = vmatmul.mubr.msk.f32.vlgmr.msra.gmra.mrb[6].mxu1 %vm512_vm4, %v3073_v10 }
 0x14a   : > { %3217 = vmatpush3.msra.mxu0 %v1223_v12  ;;  %v1315_v13 = vpop.permute.xlu0 %1314  ;;  %v1494_v14 = vpop.permute.xlu1 %1493  ;;  %3221 = vmatprep.subr.mxu1 %v3415_v4 }
 0x14b   : > { %v1319_v17 = vsel %vm1318_vm9, %v1315_v13, %v3727_v42  ;;  %3218 = vmatprep.mubr.msk.f32.mxu0 %vm3431_vm2, %v3415_v4  ;;  %3223 = vmatprep.mubr.msk.f32.mxu1 %vm3431_vm2, %v3415_v4  ;;  %v1495_v18 = vsel %vm1318_vm9, %v3717_v35, %v1494_v14 }
 0x14c   : > { %3222 = vmatpush3.msra.mxu1 %v1319_v17  ;;  %3226 = vmatprep.subr.mxu0 %v3415_v4 }
 0x14d   : > { %3219 = vmatmul.mubr.msk.f32.vlgmr.msra.gmra.mrb[8].mxu0 %vm512_vm4, %v3075_v15  ;;  %3224 = vmatmul.mubr.msk.f32.vlgmr.msra.gmra.mrb[8].mxu1 %vm512_vm4, %v3078_v16 }
 0x14e   : > { %3231 = vmatprep.subr.mxu1 %v3415_v4  ;;  %v1405_v19 = vpop.permute.xlu0 %1404  ;;  %v3822_v20 = vpop.permute.xlu1 %2648  ;;  %3228 = vmatprep.mubr.msk.f32.mxu0 %vm3431_vm2, %v3415_v4 }
 0x14f   : > { %v1409_v23 = vsel %vm1408_vm10, %v1405_v19, %v3731_v44  ;;  %3232 = vmatpush3.msra.mxu1 %v1495_v18  ;;  %3233 = vmatprep.mubr.msk.f32.mxu1 %vm3431_vm2, %v3415_v4 }
 0x150   : > { %3227 = vmatpush3.msra.mxu0 %v1409_v23  ;;  %3241 = vmatprep.subr.mxu1 %v3415_v4 }
 0x151   : > { %3229 = vmatmul.mubr.msk.f32.vlgmr.msra.gmra.mrb[10].mxu0 %vm512_vm4, %v3080_v21  ;;  %3234 = vmatmul.mubr.msk.f32.vlgmr.msra.gmra.mrb[10].mxu1 %vm512_vm4, %v3082_v22 }
 0x152   : > { %3236 = vmatprep.subr.mxu0 %v3415_v4  ;;  %3242 = vmatpush3.msra.mxu1 %v3590_v27  ;;  %v3843_v25 = vpop.permute.xlu0 %2464  ;;  %v1923_v29 = vpop.permute.xlu1 %1922  ;;  %v1739_v27 = vsel %vm443_vm0, %v3711_v26, %v3735_v46  ;;  %vm2468_vm0 = vcmask 982016  }
 0x153   : > { %3237 = vmatpush3.msra.mxu0 %v1579_v24  ;;  %3238 = vmatprep.mubr.msk.f32.mxu0 %vm3431_vm2, %v3415_v4  ;;  %v1925_v35 = vsel %vm1924_vm12, %v3721_v39, %v1923_v29  ;;  %v3095_v39 = vld [vmem:[%s3992_s5 + $0xb8] sm:$0xff] }
 0x154   : > { %3243 = vmatprep.mubr.msk.f32.mxu1 %vm3431_vm2, %v3415_v4  ;;  %3246 = vmatprep.subr.mxu0 %v3415_v4 }
 0x155   : > { %3239 = vmatmul.mubr.msk.f32.vlgmr.msra.gmra.mrb[12].mxu0 %vm512_vm4, %v3084_v30  ;;  %3244 = vmatmul.mubr.msk.f32.vlgmr.msra.gmra.mrb[12].mxu1 %vm512_vm4, %v3086_v31 }
 0x156   : > { %3247 = vmatpush3.msra.mxu0 %v1739_v27  ;;  %v1831_v28 = vpop.permute.xlu0 %1830  ;;  %v2010_v32 = vpop.permute.xlu1 %2009  ;;  %3251 = vmatprep.subr.mxu1 %v3415_v4 }
 0x157   : > { %v1835_v26 = vsel %vm1834_vm11, %v1831_v28, %v3737_v48  ;;  %3248 = vmatprep.mubr.msk.f32.mxu0 %vm3431_vm2, %v3415_v4  ;;  %3253 = vmatprep.mubr.msk.f32.mxu1 %vm3431_vm2, %v3415_v4  ;;  %v2011_v36 = vsel %vm1834_vm11, %v3725_v41, %v2010_v32 }
 0x158   : > { %3252 = vmatpush3.msra.mxu1 %v1835_v26  ;;  %3256 = vmatprep.subr.mxu0 %v3415_v4 }
 0x159   : > { %3249 = vmatmul.mubr.msk.f32.vlgmr.msra.gmra.mrb[14].mxu0 %vm512_vm4, %v3088_v33  ;;  %3254 = vmatmul.mubr.msk.f32.vlgmr.msra.gmra.mrb[14].mxu1 %vm512_vm4, %v3091_v34 }
 0x15a   : > { %3257 = vmatpush3.msra.mxu0 %v1925_v35  ;;  %3261 = vmatprep.subr.mxu1 %v3415_v4  ;;  %v2552_v37 = vpop.permute.xlu0 %2551  ;;  %v2195_v38 = vpop.permute.xlu1 %2194 }
 0x15b   : > { %3262 = vmatpush3.msra.mxu1 %v2011_v36  ;;  %v2197_v42 = vsel %vm2196_vm13, %v3729_v43, %v2195_v38  ;;  %3258 = vmatprep.mubr.msk.f32.mxu0 %vm3431_vm2, %v3415_v4  ;;  %v3098_v43 = vld [vmem:[%s3992_s5 + $0x30] sm:$0xff] }
 0x15c   : > { %3263 = vmatprep.mubr.msk.f32.mxu1 %vm3431_vm2, %v3415_v4  ;;  %3271 = vmatprep.subr.mxu1 %v3415_v4 }
 0x15d   : > { %3259 = vmatmul.mubr.msk.f32.vlgmr.msra.gmra.mrb[16].mxu0 %vm512_vm4, %v3093_v40  ;;  %3264 = vmatmul.mubr.msk.f32.vlgmr.msra.gmra.mrb[16].mxu1 %vm512_vm4, %v3095_v39 }
 0x15e   : > { %3272 = vmatpush3.msra.mxu1 %v2197_v42  ;;  %v2103_v41 = vpop.permute.xlu0 %2102  ;;  %v2282_v44 = vpop.permute.xlu1 %2281  ;;  %3266 = vmatprep.subr.mxu0 %v3415_v4 }
 0x15f   : > { %v2107_v46 = vsel %vm2106_vm14, %v2103_v41, %v3744_v52  ;;  %3268 = vmatprep.mubr.msk.f32.mxu0 %vm3431_vm2, %v3415_v4  ;;  %3273 = vmatprep.mubr.msk.f32.mxu1 %vm3431_vm2, %v3415_v4  ;;  %v2283_v48 = vsel %vm2106_vm14, %v3733_v45, %v2282_v44  ;;  %v3105_v45 = vld [vmem:[%s3992_s5 + $0x38] sm:$0xff] }
 0x160   : > { %3267 = vmatpush3.msra.mxu0 %v2107_v46  ;;  %3281 = vmatprep.subr.mxu1 %v3415_v4 }
 0x161   : > { %3269 = vmatmul.mubr.msk.f32.vlgmr.msra.gmra.mrb[18].mxu0 %vm512_vm4, %v3098_v43  ;;  %3276 = vmatprep.subr.mxu0 %v3415_v4 }
 0x162   : > { %v2375_v49 = vpop.permute.xlu0 %2374  ;;  %3277 = vmatpush3.msra.mxu0 %v2283_v48  ;;  %v2467_v50 = vpop.permute.xlu1 %2466  ;;  %3274 = vmatmul.mubr.msk.f32.vlgmr.msra.gmra.mrb[18].mxu1 %vm512_vm4, %v3100_v47 }
 0x163   : > { %v2379_v52 = vsel %vm2378_vm15, %v2375_v49, %v3754_v56  ;;  %v2469_v53 = vsel %vm2468_vm0, %v3843_v25, %v2467_v50  ;;  %3278 = vmatprep.mubr.msk.f32.mxu0 %vm3431_vm2, %v3415_v4  ;;  %3286 = vmatprep.subr.mxu0 %v3415_v4  ;;  %v3107_v56 = vld [vmem:[%s3992_s5 + $0x80] sm:$0xff] }
 0x164   : > { %3282 = vmatpush3.msra.mxu1 %v2379_v52  ;;  %3283 = vmatprep.mubr.msk.f32.mxu1 %vm3431_vm2, %v3415_v4 }
 0x165   : > { %3279 = vmatmul.mubr.msk.f32.vlgmr.msra.gmra.mrb[20].mxu0 %vm512_vm4, %v3102_v51  ;;  %3291 = vmatprep.subr.mxu1 %v3415_v4 }
 0x166   : > { %3287 = vmatpush3.msra.mxu0 %v2469_v53  ;;  %v2737_v54 = vpop.permute.xlu0 %2736  ;;  %v2554_v55 = vpop.permute.xlu1 %2553  ;;  %3284 = vmatmul.mubr.msk.f32.vlgmr.msra.gmra.mrb[20].mxu1 %vm512_vm4, %v3105_v45 }
 0x167   : > { %v2555_v57 = vsel %vm2378_vm15, %v2552_v37, %v2554_v55  ;;  %3288 = vmatprep.mubr.msk.f32.mxu0 %vm3431_vm2, %v3415_v4  ;;  %3293 = vmatprep.mubr.msk.f32.mxu1 %vm3431_vm2, %v3415_v4 }
 0x168   : > { %3292 = vmatpush3.msra.mxu1 %v2555_v57  ;;  %3296 = vmatprep.subr.mxu0 %v3415_v4 }
 0x169   : > { %3289 = vmatmul.mubr.msk.f32.vlgmr.msra.gmra.mrb[22].mxu0 %vm512_vm4, %v3107_v56  ;;  %3301 = vmatprep.subr.mxu1 %v3415_v4 }
 0x16a   : > { %v2647_v59 = vpop.permute.xlu0 %2646  ;;  %v2739_v60 = vpop.permute.xlu1 %2738  ;;  %3294 = vmatmul.mubr.msk.f32.vlgmr.msra.gmra.mrb[22].mxu1 %vm512_vm4, %v3109_v58  ;;  %3298 = vmatprep.mubr.msk.f32.mxu0 %vm3431_vm2, %v3415_v4 }
 0x16b   : > { %v2651_v62 = vsel %vm2650_vm1, %v2647_v59, %v3822_v20  ;;  %v2741_v63 = vsel %vm2740_vm3, %v2737_v54, %v2739_v60  ;;  %3303 = vmatprep.mubr.msk.f32.mxu1 %vm3431_vm2, %v3415_v4 }
 0x16c   : > { %3297 = vmatpush3.msra.mxu0 %v2651_v62  ;;  %3302 = vmatpush3.msra.mxu1 %v2741_v63 }
 0x16d   : > { %3299 = vmatmul.mubr.msk.f32.vlgmr.msra.gmra.mrb[24].mxu0 %vm512_vm4, %v3112_v61  ;;  %3306 = vmatprep.subr.mxu0 %v3415_v4 }
 0x16e   : > { %v2824_v1 = vpop.permute.xlu0 %2823  ;;  %v2826_v2 = vpop.permute.xlu1 %2825  ;;  %3304 = vmatmul.mubr.msk.f32.vlgmr.msra.gmra.mrb[24].mxu1 %vm512_vm4, %v3114_v0  ;;  %3308 = vmatprep.mubr.msk.f32.mxu0 %vm3431_vm2, %v3415_v4 }
 0x16f   : > { %v2827_v5 = vsel %vm2650_vm1, %v2824_v1, %v2826_v2 }
 0x170   : > { %3307 = vmatpush3.msra.mxu0 %v2827_v5 }
 0x171   : > { %3309 = vmatmul.mubr.msk.f32.vlgmr.msra.gmra.mrb[26].mxu0 %vm512_vm4, %v3116_v3 }
 0x208   : > { %v582_v6 = vpop.f32.mrb[0].mxu0 }
 0x209   : > { %v3180_v7 = vpop.f32.mrb[1].mxu0 }
 0x20c   : > { %v664_v8 = vpop.f32.mrb[0].mxu1 }
 0x20d   : > { %v665_v9 = vadd.f32 %v664_v8, %v582_v6  ;;  %v3185_v10 = vpop.f32.mrb[1].mxu1 }
 0x210   : > { %v847_v11 = vpop.f32.mrb[2].mxu1 }
 0x211   : > { %v3195_v12 = vpop.f32.mrb[3].mxu1 }
 0x214   : > { %v751_v13 = vpop.f32.mrb[2].mxu0 }
 0x215   : > { %v755_v14 = vadd.f32 %v751_v13, %v665_v9  ;;  %v3190_v15 = vpop.f32.mrb[3].mxu0 }
 0x217   : > { %v851_v4 = vadd.f32 %v847_v11, %v755_v14 }
 0x218   : > { %v936_v16 = vpop.f32.mrb[4].mxu0  ;;  %v1022_v17 = vpop.f32.mrb[4].mxu1 }
 0x219   : > { %v940_v18 = vadd.f32 %v936_v16, %v851_v4  ;;  %v3200_v19 = vpop.f32.mrb[5].mxu0  ;;  %v3205_v20 = vpop.f32.mrb[5].mxu1 }
 0x21b   : > { %v1026_v21 = vadd.f32 %v1022_v17, %v940_v18 }
 0x21c   : > { %v1118_v22 = vpop.f32.mrb[6].mxu0  ;;  %v1208_v23 = vpop.f32.mrb[6].mxu1 }
 0x21d   : > { %v1122_v24 = vadd.f32 %v1118_v22, %v1026_v21  ;;  %v3210_v25 = vpop.f32.mrb[7].mxu0  ;;  %v3215_v29 = vpop.f32.mrb[7].mxu1 }
 0x21e   : > { %v2907_v21 = vpop.permute.xlu0 %2906 }
 0x21f   : > { %v1212_v30 = vadd.f32 %v1208_v23, %v1122_v24 }
 0x220   : > { %v1294_v31 = vpop.f32.mrb[8].mxu0  ;;  %v1390_v27 = vpop.f32.mrb[8].mxu1 }
 0x221   : > { %v1298_v28 = vadd.f32 %v1294_v31, %v1212_v30  ;;  %v3220_v32 = vpop.f32.mrb[9].mxu0  ;;  %v3225_v33 = vpop.f32.mrb[9].mxu1 }
 0x223   : > { %v1394_v34 = vadd.f32 %v1390_v27, %v1298_v28 }
 0x224   : > { %v1480_v26 = vpop.f32.mrb[10].mxu0  ;;  %v1566_v35 = vpop.f32.mrb[10].mxu1 }
 0x225   : > { %v1484_v36 = vadd.f32 %v1480_v26, %v1394_v34  ;;  %v3230_v37 = vpop.f32.mrb[11].mxu0  ;;  %v3235_v38 = vpop.f32.mrb[11].mxu1 }
 0x227   : > { %v1570_v40 = vadd.f32 %v1566_v35, %v1484_v36 }
 0x228   : > { %v1650_v39 = vpop.f32.mrb[12].mxu0  ;;  %v1726_v42 = vpop.f32.mrb[12].mxu1 }
 0x229   : > { %v1654_v41 = vadd.f32 %v1650_v39, %v1570_v40  ;;  %v3240_v44 = vpop.f32.mrb[13].mxu0  ;;  %v3245_v43 = vpop.f32.mrb[13].mxu1 }
 0x22b   : > { %v1730_v46 = vadd.f32 %v1726_v42, %v1654_v41 }
 0x22c   : > { %v1810_v47 = vpop.f32.mrb[14].mxu0  ;;  %v1906_v48 = vpop.f32.mrb[14].mxu1 }
 0x22d   : > { %v1814_v49 = vadd.f32 %v1810_v47, %v1730_v46  ;;  %v3250_v50 = vpop.f32.mrb[15].mxu0  ;;  %v3255_v51 = vpop.f32.mrb[15].mxu1 }
 0x22f   : > { %v1910_v52 = vadd.f32 %v1906_v48, %v1814_v49 }
 0x230   : > { %v1996_v53 = vpop.f32.mrb[16].mxu0  ;;  %v2082_v45 = vpop.f32.mrb[16].mxu1 }
 0x231   : > { %v2000_v54 = vadd.f32 %v1996_v53, %v1910_v52  ;;  %v3260_v55 = vpop.f32.mrb[17].mxu0  ;;  %v3265_v56 = vpop.f32.mrb[17].mxu1 }
 0x233   : > { %v2086_v57 = vadd.f32 %v2082_v45, %v2000_v54 }
 0x234   : > { %v2178_v58 = vpop.f32.mrb[18].mxu0 }
 0x235   : > { %v2182_v59 = vadd.f32 %v2178_v58, %v2086_v57  ;;  %v2268_v60 = vpop.f32.mrb[18].mxu1  ;;  %v3270_v61 = vpop.f32.mrb[19].mxu0 }
 0x236   : > { %v3275_v62 = vpop.f32.mrb[19].mxu1 }
 0x237   : > { %v2272_v63 = vadd.f32 %v2268_v60, %v2182_v59 }
 0x238   : > { %v2354_v0 = vpop.f32.mrb[20].mxu0 }
 0x239   : > { %v2358_v1 = vadd.f32 %v2354_v0, %v2272_v63  ;;  %v2450_v2 = vpop.f32.mrb[20].mxu1  ;;  %v3280_v3 = vpop.f32.mrb[21].mxu0 }
 0x23a   : > { %v3285_v5 = vpop.f32.mrb[21].mxu1 }
 0x23b   : > { %v2454_v6 = vadd.f32 %v2450_v2, %v2358_v1 }
 0x23c   : > { %v2540_v7 = vpop.f32.mrb[22].mxu0 }
 0x23d   : > { %v2544_v8 = vadd.f32 %v2540_v7, %v2454_v6  ;;  %v2626_v9 = vpop.f32.mrb[22].mxu1  ;;  %v3290_v10 = vpop.f32.mrb[23].mxu0 }
 0x23e   : > { %v3295_v11 = vpop.f32.mrb[23].mxu1 }
 0x23f   : > { %v2630_v12 = vadd.f32 %v2626_v9, %v2544_v8 }
 0x240   : > { %v2722_v13 = vpop.f32.mrb[24].mxu0 }
 0x241   : > { %v2726_v14 = vadd.f32 %v2722_v13, %v2630_v12  ;;  %v2812_v15 = vpop.f32.mrb[24].mxu1  ;;  %v3300_v4 = vpop.f32.mrb[25].mxu0 }
 0x242   : > { %v3305_v16 = vpop.f32.mrb[25].mxu1 }
 0x243   : > { %v2816_v17 = vadd.f32 %v2812_v15, %v2726_v14 }
 0x244   : > { %v2898_v18 = vpop.f32.mrb[26].mxu0 }
 0x245   : > { %v2902_v19 = vadd.f32 %v2898_v18, %v2816_v17  ;;  %v3310_v20 = vpop.f32.mrb[27].mxu0 }
 0x247   : > { %v2909_v22 = vadd.f32 %v2907_v21, %v2902_v19 }
 0x249   : > { %2910 = vst [vmem:[%s440_s19] sm:$0xff] %v2909_v22 }
 0x24a PF: > { %s18_s9 = sadd.s32 1, %s3410_s9   ;;  %s4048_s27 = smov %s3402_s29 }
 0x24b   : > { %p15_p11 = scmp.ge.s32.totalorder %s18_s9, 6   ;;  %s4049_s28 = smov %s3406_s30 }
 0x24c   : > { %s4050_s29 = smov %s4053_s10  ;;  %s4051_s30 = smov %s4057_s11 }
 0x24d   :  { %17 = sbr.rel (!%p15_p11) target bundleno = 4 (0x4), region = 114 }

</bundles_post_ra>
